<compile_context>
chip_gen: v7x
topology: tpu7x:2x2x1
jax: 0.10.0
libtpu: 0.0.40
codegen_flags: <defaults>
</compile_context>

<pallas_src>
import jax
import jax.numpy as jnp
import numpy as np
from jax.experimental import pallas as pl
from jax.experimental.pallas import tpu as pltpu

# ----------------------- model hyper-parameters (small) -----------------------
NUM_LAYERS = 2
D_MODEL = 32
NUM_HEADS = 4
DEPTH = D_MODEL // NUM_HEADS
DFF = 64
LN_EPS = 1e-6
MASK_NEG = -1e19
LANE = 128                       # vreg lane width: lane-dense output + slab padding

# bf16 weight-slab row layout (per layer, then the output head)
W_QKV_OFF = 0
W_O_OFF = D_MODEL
W_1_OFF = 2 * D_MODEL
W_2_OFF = 3 * D_MODEL
W_LAYER_ROWS = 3 * D_MODEL + DFF          # 160 rows / layer
W_OUT_ROW = NUM_LAYERS * W_LAYER_ROWS     # 320
# f32 misc-slab row layout: [pos (S rows)] [8 rows per layer] [1 row out-bias]
M_LAYER_ROWS = 8


# ------------------------------ fused kernel ----------------------------------
def fused_preatt_kernel(aug_ref, wslab_ref, mslab_ref, out_ref):
    """Whole PreAttModel forward for the full batch in one kernel invocation."""
    B, S, _ = aug_ref.shape
    D, H, depth = D_MODEL, NUM_HEADS, DEPTH
    BS = B * S
    scale = float(1.0 / np.sqrt(depth))
    bf16 = jnp.bfloat16

    aug = aug_ref[...]                                       # (B,S,D+S+1) f32
    # pos-enc add; flatten (B,S) into the matmul M dimension
    x = (aug[:, :, 0:D] + mslab_ref[0:S, 0:D]).reshape(BS, D)            # (BS,D)
    # additive -1e19 mask biases, carried inside the single aug ref (no extra DMAs,
    # no in-kernel lane<->sublane relayout): key bias per (row, key) and row bias.
    negk = aug[:, :, D:D + S].reshape(BS, S)                 # (BS,S)
    negrow = aug[:, :, D + S:D + S + 1].reshape(BS, 1)       # (BS,1)

    def to_heads(t, off):
        # (BS,3D) --static lane slices + tile-aligned leading reshape--> (H*B,S,depth)
        parts = [t[:, off + h * depth: off + (h + 1) * depth].reshape(B, S, depth)
                 for h in range(H)]
        return jnp.concatenate(parts, axis=0)                # head-major: n = h*B + b

    for l in range(NUM_LAYERS):                              # statically unrolled
        wb = l * W_LAYER_ROWS
        mb = S + l * M_LAYER_ROWS
        wqkv = wslab_ref[wb + W_QKV_OFF: wb + W_QKV_OFF + D, 0:3 * D]      # bf16 (D,3D)
        wo_h = wslab_ref[wb + W_O_OFF: wb + W_O_OFF + D, 0:D].reshape(H, depth, D)
        w1 = wslab_ref[wb + W_1_OFF: wb + W_1_OFF + D, 0:DFF]
        w2 = wslab_ref[wb + W_2_OFF: wb + W_2_OFF + DFF, 0:D]
        bqkv = mslab_ref[mb + 0: mb + 1, 0:3 * D]
        bo = mslab_ref[mb + 1: mb + 2, 0:D]
        fb1 = mslab_ref[mb + 2: mb + 3, 0:DFF]
        fb2 = mslab_ref[mb + 3: mb + 4, 0:D]
        g1 = mslab_ref[mb + 4: mb + 5, 0:D]
        be1 = mslab_ref[mb + 5: mb + 6, 0:D]
        g2 = mslab_ref[mb + 6: mb + 7, 0:D]
        be2 = mslab_ref[mb + 7: mb + 8, 0:D]

        # ---------------- multi-head attention ----------------
        qkv = jnp.dot(x.astype(bf16), wqkv,
                      preferred_element_type=jnp.float32) + bqkv          # (BS,3D) f32
        qh = to_heads(qkv, 0).astype(bf16)                                # (H*B,S,depth)
        kh = to_heads(qkv, D).astype(bf16)
        vh = to_heads(qkv, 2 * D).astype(bf16)

        logits = jnp.einsum('bqd,bkd->bqk', qh, kh,
                            preferred_element_type=jnp.float32) * scale   # (H*B,S,S)
        # key-padding bias: leading-dim reshape + broadcast over heads (no concat)
        logits = logits.reshape(H, BS, S) + negk
        logits = logits - jnp.max(logits, axis=-1, keepdims=True)
        p = jnp.exp(logits)
        p = p * pl.reciprocal(jnp.sum(p, axis=-1, keepdims=True), approx=True)
        p = p.reshape(H * B, S, S).astype(bf16)
        ctx = jnp.einsum('bqk,bkd->bqd', p, vh,
                         preferred_element_type=jnp.float32)              # (H*B,S,depth)

        # W_O as a head-batched contraction + leading-axis sum (no lane re-concat)
        ctx3 = ctx.reshape(H, BS, depth).astype(bf16)
        attn_h = jnp.einsum('hmd,hdn->hmn', ctx3, wo_h,
                            preferred_element_type=jnp.float32)           # (H,BS,D)
        attn = bo + attn_h[0]
        for h in range(1, H):
            attn = attn + attn_h[h]

        # ---------------- residual + LayerNorm 1 (rsqrt -> EUP) ----------------
        h1 = x + attn
        mu = jnp.mean(h1, axis=-1, keepdims=True)
        var = jnp.mean((h1 - mu) ** 2, axis=-1, keepdims=True)
        h1 = (h1 - mu) * jax.lax.rsqrt(var + LN_EPS) * g1 + be1

        # ---------------- point-wise feed-forward ----------------
        f = jnp.dot(h1.astype(bf16), w1, preferred_element_type=jnp.float32) + fb1
        f = jnp.maximum(f, 0.0)
        f = jnp.dot(f.astype(bf16), w2, preferred_element_type=jnp.float32) + fb2

        # ---------------- residual + LayerNorm 2 ----------------
        h2 = h1 + f
        mu = jnp.mean(h2, axis=-1, keepdims=True)
        var = jnp.mean((h2 - mu) ** 2, axis=-1, keepdims=True)
        x = (h2 - mu) * jax.lax.rsqrt(var + LN_EPS) * g2 + be2

    # ---- out_layer (D->1) + padding bias + exp, lane-dense (BS,128) store ----
    wout = wslab_ref[W_OUT_ROW: W_OUT_ROW + D, :]            # (D,128) bf16, replicated
    bout_row = S + NUM_LAYERS * M_LAYER_ROWS
    bout = mslab_ref[bout_row: bout_row + 1, 0:1]            # (1,1)
    logits = jnp.dot(x.astype(bf16), wout, preferred_element_type=jnp.float32)
    out_ref[...] = jnp.exp(logits + bout + negrow)


# ------------------------------ wrapper ---------------------------------------
def pre_att_model_forward(inp, orig_mask, packed):
    """Full PreAttModel forward: one fused Pallas kernel + trivial XLA layout glue."""
    B, S, D = inp.shape
    padbias = (orig_mask == 0).astype(jnp.float32) * MASK_NEG             # (B,S)
    # One augmented data ref carrying input + both mask-bias layouts (key & row),
    # so the kernel needs no mask DMAs and no in-kernel relayout.
    aug = jnp.concatenate(
        [inp,
         jnp.broadcast_to(padbias[:, None, :], (B, S, S)),
         padbias[:, :, None]],
        axis=-1)                                                          # (B,S,D+S+1)
    # TODO(synk): for serving loops, keep wslab/mslab resident across calls
    # (cross-call prefetch) instead of re-DMAing ~100 KB per invocation.
    out = pl.pallas_call(
        fused_preatt_kernel,
        out_shape=jax.ShapeDtypeStruct((B * S, LANE), jnp.float32),
        in_specs=[pl.BlockSpec(memory_space=pltpu.MemorySpace.VMEM)] * 3,
        out_specs=pl.BlockSpec(memory_space=pltpu.MemorySpace.VMEM),
    )(aug, packed["wslab"], packed["mslab"])
    # lane-dense (B*S,128) slab -> (B,S); layout plumbing only, done in the wrapper.
    return out[:, 0].reshape(B, S)


# ------------------------- parameter initialization ---------------------------
def _linear(key, fan_in, fan_out, scale=0.05):
    kw, kb = jax.random.split(key)
    w = scale * jax.random.normal(kw, (fan_in, fan_out), dtype=jnp.float32)
    b = 0.02 * jax.random.normal(kb, (1, fan_out), dtype=jnp.float32)
    return w, b


def init_params(key):
    """'Natural' (unpacked) parameters; Linear weights stored as (in, out)."""
    layer_params_list = []
    for _ in range(NUM_LAYERS):
        key, kq, kk, kv, ko, k1, k2 = jax.random.split(key, 7)
        wq, bq = _linear(kq, D_MODEL, D_MODEL)
        wk, bk = _linear(kk, D_MODEL, D_MODEL)
        wv, bv = _linear(kv, D_MODEL, D_MODEL)
        wo, bo = _linear(ko, D_MODEL, D_MODEL)
        g1 = jnp.ones((1, D_MODEL), jnp.float32)
        be1 = jnp.zeros((1, D_MODEL), jnp.float32)
        w1, fb1 = _linear(k1, D_MODEL, DFF)
        w2, fb2 = _linear(k2, DFF, D_MODEL)
        g2 = jnp.ones((1, D_MODEL), jnp.float32)
        be2 = jnp.zeros((1, D_MODEL), jnp.float32)
        layer_params_list.append(
            (wq, bq, wk, bk, wv, bv, wo, bo, g1, be1, w1, fb1, w2, fb2, g2, be2))
    key, kout, kpe = jax.random.split(key, 3)
    w_out, b_out = _linear(kout, D_MODEL, 1)            # (D,1), (1,1)
    # torch init is zeros; small random values so the pos-enc path is exercised.
    pos_enc = 0.02 * jax.random.normal(kpe, (1, 1024, D_MODEL), dtype=jnp.float32)
    return pos_enc, layer_params_list, w_out, b_out


def _pad_lanes(x):
    return jnp.pad(x, ((0, 0), (0, LANE - x.shape[-1])))


def pack_params(params, seq_len):
    """Pack everything into two slabs: bf16 weights (352,128) + f32 misc (25,128)."""
    pos_enc, lps, w_out, b_out = params
    wrows = []
    mrows = [_pad_lanes(pos_enc[0, :seq_len, :])]                # pos slice (S rows)
    for (wq, bq, wk, bk, wv, bv, wo, bo, g1, be1,
         w1, fb1, w2, fb2, g2, be2) in lps:
        wrows += [_pad_lanes(jnp.concatenate([wq, wk, wv], axis=1)),   # (D,3D)
                  _pad_lanes(wo),                                       # (D,D) head-major rows
                  _pad_lanes(w1), _pad_lanes(w2)]
        mrows += [_pad_lanes(jnp.concatenate([bq, bk, bv], axis=1)),
                  _pad_lanes(bo), _pad_lanes(fb1), _pad_lanes(fb2),
                  _pad_lanes(g1), _pad_lanes(be1), _pad_lanes(g2), _pad_lanes(be2)]
    # (D,1) head weight replicated across all 128 lanes -> unmasked lane-dense store
    wrows.append(jnp.broadcast_to(w_out, (D_MODEL, LANE)))
    mrows.append(_pad_lanes(b_out))
    return {"wslab": jnp.concatenate(wrows, axis=0).astype(jnp.bfloat16),
            "mslab": jnp.concatenate(mrows, axis=0).astype(jnp.float32)}


# ----------------------------- pure-JAX reference ------------------------------
def _layernorm(x, g, b):
    mu = jnp.mean(x, axis=-1, keepdims=True)
    var = jnp.mean((x - mu) ** 2, axis=-1, keepdims=True)
    return (x - mu) / jnp.sqrt(var + LN_EPS) * g + b


def ref_forward(inp, orig_mask, params):
    pos_enc, layer_params_list, w_out, b_out = params
    B, S, D = inp.shape
    pad = (orig_mask == 0).astype(jnp.float32)
    h = inp + pos_enc[:, :S, :]
    for (wq, bq, wk, bk, wv, bv, wo, bo, g1, be1,
         w1, fb1, w2, fb2, g2, be2) in layer_params_list:
        q = (h @ wq + bq).reshape(B, S, NUM_HEADS, DEPTH).transpose(0, 2, 1, 3)
        k = (h @ wk + bk).reshape(B, S, NUM_HEADS, DEPTH).transpose(0, 2, 1, 3)
        v = (h @ wv + bv).reshape(B, S, NUM_HEADS, DEPTH).transpose(0, 2, 1, 3)
        logits = jnp.einsum('bhqd,bhkd->bhqk', q, k) / np.sqrt(DEPTH)
        logits = logits + pad[:, None, None, :] * MASK_NEG
        attnw = jax.nn.softmax(logits, axis=-1)
        o = jnp.einsum('bhqk,bhkd->bhqd', attnw, v)
        o = o.transpose(0, 2, 1, 3).reshape(B, S, D) @ wo + bo
        h1 = _layernorm(h + o, g1, be1)
        f = jax.nn.relu(h1 @ w1 + fb1) @ w2 + fb2
        h = _layernorm(h1 + f, g2, be2)
    logits = (h @ w_out)[..., 0] + b_out[0, 0]
    logits = logits + pad * MASK_NEG
    return jnp.exp(logits)


# ----------------------------------- main --------------------------------------
if __name__ == "__main__":
    B, S = 2, 8
    key = jax.random.PRNGKey(0)
    k_inp, k_par = jax.random.split(key)

    inp = jax.random.normal(k_inp, (B, S, D_MODEL), dtype=jnp.float32)
    orig_mask = jnp.array([[1, 1, 1, 1, 1, 0, 0, 0],
                           [1, 1, 1, 1, 1, 1, 1, 0]], dtype=jnp.float32)
    params = init_params(k_par)
    packed = pack_params(params, seq_len=S)      # one-time packing into two slabs

    fwd = jax.jit(pre_att_model_forward)
    out = jax.block_until_ready(fwd(inp, orig_mask, packed))

    ref = jax.block_until_ready(ref_forward(inp, orig_mask, params))
    # bf16 matmul operands + approx-reciprocal softmax -> looser tolerance than f32
    np.testing.assert_allclose(np.asarray(out), np.asarray(ref), rtol=2e-2, atol=1e-6)

    print("KERNEL_OK")
</pallas_src>

<mosaic_0001>
module attributes {stable_mosaic.version = 11 : i64} {
  func.func @fused_preatt_kernel(%arg0: memref<2x8x41xf32, #tpu.memory_space<vmem>>, %arg1: memref<352x128xbf16, #tpu.memory_space<vmem>>, %arg2: memref<25x128xf32, #tpu.memory_space<vmem>>, %arg3: memref<16x128xf32, #tpu.memory_space<vmem>>) attributes {dimension_semantics = [], scalar_prefetch = 0 : i64, scratch_operands = 0 : i64, tpu.core_type = #tpu.core_type<tc>} {
    %c0 = arith.constant 0 : index
    %c0_0 = arith.constant 0 : index
    %c0_1 = arith.constant 0 : index
    %0 = vector.load %arg0[%c0, %c0_0, %c0_1] : memref<2x8x41xf32, #tpu.memory_space<vmem>>, vector<2x8x41xf32>
    %1 = vector.extract_strided_slice %0 {offsets = [0, 0, 0], sizes = [2, 8, 32], strides = [1, 1, 1]} : vector<2x8x41xf32> to vector<2x8x32xf32>
    %c0_2 = arith.constant 0 : index
    %c0_3 = arith.constant 0 : index
    %2 = vector.load %arg2[%c0_2, %c0_3] : memref<25x128xf32, #tpu.memory_space<vmem>>, vector<8x32xf32>
    %3 = vector.shape_cast %2 : vector<8x32xf32> to vector<1x8x32xf32>
    %4 = vector.broadcast %3 : vector<1x8x32xf32> to vector<2x8x32xf32>
    %5 = arith.addf %1, %4 : vector<2x8x32xf32>
    %6 = vector.shape_cast %5 : vector<2x8x32xf32> to vector<16x32xf32>
    %7 = vector.extract_strided_slice %0 {offsets = [0, 0, 32], sizes = [2, 8, 8], strides = [1, 1, 1]} : vector<2x8x41xf32> to vector<2x8x8xf32>
    %8 = vector.shape_cast %7 : vector<2x8x8xf32> to vector<16x8xf32>
    %9 = vector.extract_strided_slice %0 {offsets = [0, 0, 40], sizes = [2, 8, 1], strides = [1, 1, 1]} : vector<2x8x41xf32> to vector<2x8x1xf32>
    %10 = vector.shape_cast %9 : vector<2x8x1xf32> to vector<16x1xf32>
    %c0_4 = arith.constant 0 : index
    %c0_5 = arith.constant 0 : index
    %11 = vector.load %arg1[%c0_4, %c0_5] : memref<352x128xbf16, #tpu.memory_space<vmem>>, vector<32x96xbf16>
    %c32 = arith.constant 32 : index
    %c0_6 = arith.constant 0 : index
    %12 = vector.load %arg1[%c32, %c0_6] : memref<352x128xbf16, #tpu.memory_space<vmem>>, vector<32x32xbf16>
    %13 = vector.shape_cast %12 : vector<32x32xbf16> to vector<4x8x32xbf16>
    %c64 = arith.constant 64 : index
    %c0_7 = arith.constant 0 : index
    %14 = vector.load %arg1[%c64, %c0_7] : memref<352x128xbf16, #tpu.memory_space<vmem>>, vector<32x64xbf16>
    %c96 = arith.constant 96 : index
    %c0_8 = arith.constant 0 : index
    %15 = vector.load %arg1[%c96, %c0_8] : memref<352x128xbf16, #tpu.memory_space<vmem>>, vector<64x32xbf16>
    %c8 = arith.constant 8 : index
    %c0_9 = arith.constant 0 : index
    %16 = vector.load %arg2[%c8, %c0_9] : memref<25x128xf32, #tpu.memory_space<vmem>>, vector<1x96xf32>
    %c9 = arith.constant 9 : index
    %c0_10 = arith.constant 0 : index
    %17 = vector.load %arg2[%c9, %c0_10] : memref<25x128xf32, #tpu.memory_space<vmem>>, vector<1x32xf32>
    %c10 = arith.constant 10 : index
    %c0_11 = arith.constant 0 : index
    %18 = vector.load %arg2[%c10, %c0_11] : memref<25x128xf32, #tpu.memory_space<vmem>>, vector<1x64xf32>
    %c11 = arith.constant 11 : index
    %c0_12 = arith.constant 0 : index
    %19 = vector.load %arg2[%c11, %c0_12] : memref<25x128xf32, #tpu.memory_space<vmem>>, vector<1x32xf32>
    %c12 = arith.constant 12 : index
    %c0_13 = arith.constant 0 : index
    %20 = vector.load %arg2[%c12, %c0_13] : memref<25x128xf32, #tpu.memory_space<vmem>>, vector<1x32xf32>
    %c13 = arith.constant 13 : index
    %c0_14 = arith.constant 0 : index
    %21 = vector.load %arg2[%c13, %c0_14] : memref<25x128xf32, #tpu.memory_space<vmem>>, vector<1x32xf32>
    %c14 = arith.constant 14 : index
    %c0_15 = arith.constant 0 : index
    %22 = vector.load %arg2[%c14, %c0_15] : memref<25x128xf32, #tpu.memory_space<vmem>>, vector<1x32xf32>
    %c15 = arith.constant 15 : index
    %c0_16 = arith.constant 0 : index
    %23 = vector.load %arg2[%c15, %c0_16] : memref<25x128xf32, #tpu.memory_space<vmem>>, vector<1x32xf32>
    %24 = arith.truncf %6 : vector<16x32xf32> to vector<16x32xbf16>
    %cst = arith.constant dense<0.000000e+00> : vector<16x96xf32>
    %25 = tpu.matmul %24, %11, %cst {dimension_numbers = #tpu.dot_dimension_numbers<[1], [0], [0], [1], [0, 0, 1, 1], [], []>} : vector<16x32xbf16>, vector<32x96xbf16>, vector<16x96xf32> -> vector<16x96xf32>
    %26 = vector.broadcast %16 : vector<1x96xf32> to vector<16x96xf32>
    %27 = arith.addf %25, %26 : vector<16x96xf32>
    %28 = vector.extract_strided_slice %27 {offsets = [0, 0], sizes = [16, 8], strides = [1, 1]} : vector<16x96xf32> to vector<16x8xf32>
    %29 = vector.shape_cast %28 : vector<16x8xf32> to vector<2x8x8xf32>
    %30 = vector.extract_strided_slice %27 {offsets = [0, 8], sizes = [16, 8], strides = [1, 1]} : vector<16x96xf32> to vector<16x8xf32>
    %31 = vector.shape_cast %30 : vector<16x8xf32> to vector<2x8x8xf32>
    %32 = vector.extract_strided_slice %27 {offsets = [0, 16], sizes = [16, 8], strides = [1, 1]} : vector<16x96xf32> to vector<16x8xf32>
    %33 = vector.shape_cast %32 : vector<16x8xf32> to vector<2x8x8xf32>
    %34 = vector.extract_strided_slice %27 {offsets = [0, 24], sizes = [16, 8], strides = [1, 1]} : vector<16x96xf32> to vector<16x8xf32>
    %35 = vector.shape_cast %34 : vector<16x8xf32> to vector<2x8x8xf32>
    %36 = tpu.concatenate %29, %31, %33, %35 in 0 : vector<2x8x8xf32>, vector<2x8x8xf32>, vector<2x8x8xf32>, vector<2x8x8xf32> -> vector<8x8x8xf32>
    %37 = arith.truncf %36 : vector<8x8x8xf32> to vector<8x8x8xbf16>
    %38 = vector.extract_strided_slice %27 {offsets = [0, 32], sizes = [16, 8], strides = [1, 1]} : vector<16x96xf32> to vector<16x8xf32>
    %39 = vector.shape_cast %38 : vector<16x8xf32> to vector<2x8x8xf32>
    %40 = vector.extract_strided_slice %27 {offsets = [0, 40], sizes = [16, 8], strides = [1, 1]} : vector<16x96xf32> to vector<16x8xf32>
    %41 = vector.shape_cast %40 : vector<16x8xf32> to vector<2x8x8xf32>
    %42 = vector.extract_strided_slice %27 {offsets = [0, 48], sizes = [16, 8], strides = [1, 1]} : vector<16x96xf32> to vector<16x8xf32>
    %43 = vector.shape_cast %42 : vector<16x8xf32> to vector<2x8x8xf32>
    %44 = vector.extract_strided_slice %27 {offsets = [0, 56], sizes = [16, 8], strides = [1, 1]} : vector<16x96xf32> to vector<16x8xf32>
    %45 = vector.shape_cast %44 : vector<16x8xf32> to vector<2x8x8xf32>
    %46 = tpu.concatenate %39, %41, %43, %45 in 0 : vector<2x8x8xf32>, vector<2x8x8xf32>, vector<2x8x8xf32>, vector<2x8x8xf32> -> vector<8x8x8xf32>
    %47 = arith.truncf %46 : vector<8x8x8xf32> to vector<8x8x8xbf16>
    %48 = vector.extract_strided_slice %27 {offsets = [0, 64], sizes = [16, 8], strides = [1, 1]} : vector<16x96xf32> to vector<16x8xf32>
    %49 = vector.shape_cast %48 : vector<16x8xf32> to vector<2x8x8xf32>
    %50 = vector.extract_strided_slice %27 {offsets = [0, 72], sizes = [16, 8], strides = [1, 1]} : vector<16x96xf32> to vector<16x8xf32>
    %51 = vector.shape_cast %50 : vector<16x8xf32> to vector<2x8x8xf32>
    %52 = vector.extract_strided_slice %27 {offsets = [0, 80], sizes = [16, 8], strides = [1, 1]} : vector<16x96xf32> to vector<16x8xf32>
    %53 = vector.shape_cast %52 : vector<16x8xf32> to vector<2x8x8xf32>
    %54 = vector.extract_strided_slice %27 {offsets = [0, 88], sizes = [16, 8], strides = [1, 1]} : vector<16x96xf32> to vector<16x8xf32>
    %55 = vector.shape_cast %54 : vector<16x8xf32> to vector<2x8x8xf32>
    %56 = tpu.concatenate %49, %51, %53, %55 in 0 : vector<2x8x8xf32>, vector<2x8x8xf32>, vector<2x8x8xf32>, vector<2x8x8xf32> -> vector<8x8x8xf32>
    %57 = arith.truncf %56 : vector<8x8x8xf32> to vector<8x8x8xbf16>
    "tpu.trace_start"() <{level = 10 : i32, message = "bqd,bkd->bqk"}> : () -> ()
    %cst_17 = arith.constant dense<0.000000e+00> : vector<8x8x8xf32>
    %58 = tpu.matmul %37, %47, %cst_17 {dimension_numbers = #tpu.dot_dimension_numbers<[2], [2], [1], [1], [0, 0, 0, 1, 1, 1], [0], [0]>} : vector<8x8x8xbf16>, vector<8x8x8xbf16>, vector<8x8x8xf32> -> vector<8x8x8xf32>
    "tpu.trace_stop"() : () -> ()
    %cst_18 = arith.constant 0.353553385 : f32
    %59 = vector.broadcast %cst_18 : f32 to vector<8x8x8xf32>
    %60 = arith.mulf %58, %59 : vector<8x8x8xf32>
    %61 = vector.shape_cast %60 : vector<8x8x8xf32> to vector<4x16x8xf32>
    %62 = vector.shape_cast %8 : vector<16x8xf32> to vector<1x16x8xf32>
    %63 = vector.broadcast %62 : vector<1x16x8xf32> to vector<4x16x8xf32>
    %64 = arith.addf %61, %63 : vector<4x16x8xf32>
    %cst_19 = arith.constant dense<0xFF800000> : vector<4x16xf32>
    %65 = vector.multi_reduction <maximumf>, %64, %cst_19 [2] : vector<4x16x8xf32> to vector<4x16xf32>
    %66 = vector.shape_cast %65 : vector<4x16xf32> to vector<4x16x1xf32>
    %67 = vector.broadcast %66 : vector<4x16x1xf32> to vector<4x16x8xf32>
    %68 = arith.subf %64, %67 : vector<4x16x8xf32>
    %69 = math.exp %68 : vector<4x16x8xf32>
    %cst_20 = arith.constant dense<0.000000e+00> : vector<4x16xf32>
    %70 = vector.multi_reduction <add>, %69, %cst_20 [2] : vector<4x16x8xf32> to vector<4x16xf32>
    %71 = vector.shape_cast %70 : vector<4x16xf32> to vector<4x16x1xf32>
    %72 = tpu.reciprocal %71 {approx = true} : vector<4x16x1xf32> -> vector<4x16x1xf32>
    %73 = vector.broadcast %72 : vector<4x16x1xf32> to vector<4x16x8xf32>
    %74 = arith.mulf %69, %73 : vector<4x16x8xf32>
    %75 = vector.shape_cast %74 : vector<4x16x8xf32> to vector<8x8x8xf32>
    %76 = arith.truncf %75 : vector<8x8x8xf32> to vector<8x8x8xbf16>
    "tpu.trace_start"() <{level = 10 : i32, message = "bqk,bkd->bqd"}> : () -> ()
    %cst_21 = arith.constant dense<0.000000e+00> : vector<8x8x8xf32>
    %77 = tpu.matmul %76, %57, %cst_21 {dimension_numbers = #tpu.dot_dimension_numbers<[2], [1], [1], [2], [0, 0, 0, 1, 1, 2], [0], [0]>} : vector<8x8x8xbf16>, vector<8x8x8xbf16>, vector<8x8x8xf32> -> vector<8x8x8xf32>
    "tpu.trace_stop"() : () -> ()
    %78 = vector.shape_cast %77 : vector<8x8x8xf32> to vector<4x16x8xf32>
    %79 = arith.truncf %78 : vector<4x16x8xf32> to vector<4x16x8xbf16>
    "tpu.trace_start"() <{level = 10 : i32, message = "hmd,hdn->hmn"}> : () -> ()
    %cst_22 = arith.constant dense<0.000000e+00> : vector<4x16x32xf32>
    %80 = tpu.matmul %79, %13, %cst_22 {dimension_numbers = #tpu.dot_dimension_numbers<[2], [1], [1], [2], [0, 0, 0, 1, 1, 2], [0], [0]>} : vector<4x16x8xbf16>, vector<4x8x32xbf16>, vector<4x16x32xf32> -> vector<4x16x32xf32>
    "tpu.trace_stop"() : () -> ()
    %81 = vector.extract_strided_slice %80 {offsets = [0, 0, 0], sizes = [1, 16, 32], strides = [1, 1, 1]} : vector<4x16x32xf32> to vector<1x16x32xf32>
    %82 = vector.shape_cast %81 : vector<1x16x32xf32> to vector<16x32xf32>
    %83 = vector.broadcast %17 : vector<1x32xf32> to vector<16x32xf32>
    %84 = arith.addf %83, %82 : vector<16x32xf32>
    %85 = vector.extract_strided_slice %80 {offsets = [1, 0, 0], sizes = [1, 16, 32], strides = [1, 1, 1]} : vector<4x16x32xf32> to vector<1x16x32xf32>
    %86 = vector.shape_cast %85 : vector<1x16x32xf32> to vector<16x32xf32>
    %87 = arith.addf %84, %86 : vector<16x32xf32>
    %88 = vector.extract_strided_slice %80 {offsets = [2, 0, 0], sizes = [1, 16, 32], strides = [1, 1, 1]} : vector<4x16x32xf32> to vector<1x16x32xf32>
    %89 = vector.shape_cast %88 : vector<1x16x32xf32> to vector<16x32xf32>
    %90 = arith.addf %87, %89 : vector<16x32xf32>
    %91 = vector.extract_strided_slice %80 {offsets = [3, 0, 0], sizes = [1, 16, 32], strides = [1, 1, 1]} : vector<4x16x32xf32> to vector<1x16x32xf32>
    %92 = vector.shape_cast %91 : vector<1x16x32xf32> to vector<16x32xf32>
    %93 = arith.addf %90, %92 : vector<16x32xf32>
    %94 = arith.addf %6, %93 : vector<16x32xf32>
    %cst_23 = arith.constant dense<0.000000e+00> : vector<16xf32>
    %95 = vector.multi_reduction <add>, %94, %cst_23 [1] : vector<16x32xf32> to vector<16xf32>
    %96 = vector.shape_cast %95 : vector<16xf32> to vector<16x1xf32>
    %cst_24 = arith.constant 3.200000e+01 : f32
    %97 = vector.broadcast %cst_24 : f32 to vector<16x1xf32>
    %98 = arith.divf %96, %97 : vector<16x1xf32>
    %99 = vector.broadcast %98 : vector<16x1xf32> to vector<16x32xf32>
    %100 = arith.subf %94, %99 : vector<16x32xf32>
    %101 = arith.mulf %100, %100 : vector<16x32xf32>
    %cst_25 = arith.constant dense<0.000000e+00> : vector<16xf32>
    %102 = vector.multi_reduction <add>, %101, %cst_25 [1] : vector<16x32xf32> to vector<16xf32>
    %103 = vector.shape_cast %102 : vector<16xf32> to vector<16x1xf32>
    %cst_26 = arith.constant 3.200000e+01 : f32
    %104 = vector.broadcast %cst_26 : f32 to vector<16x1xf32>
    %105 = arith.divf %103, %104 : vector<16x1xf32>
    %106 = vector.broadcast %98 : vector<16x1xf32> to vector<16x32xf32>
    %107 = arith.subf %94, %106 : vector<16x32xf32>
    %cst_27 = arith.constant 9.99999997E-7 : f32
    %108 = vector.broadcast %cst_27 : f32 to vector<16x1xf32>
    %109 = arith.addf %105, %108 : vector<16x1xf32>
    %110 = math.rsqrt %109 : vector<16x1xf32>
    %111 = vector.broadcast %110 : vector<16x1xf32> to vector<16x32xf32>
    %112 = arith.mulf %107, %111 : vector<16x32xf32>
    %113 = vector.broadcast %20 : vector<1x32xf32> to vector<16x32xf32>
    %114 = arith.mulf %112, %113 : vector<16x32xf32>
    %115 = vector.broadcast %21 : vector<1x32xf32> to vector<16x32xf32>
    %116 = arith.addf %114, %115 : vector<16x32xf32>
    %117 = arith.truncf %116 : vector<16x32xf32> to vector<16x32xbf16>
    %cst_28 = arith.constant dense<0.000000e+00> : vector<16x64xf32>
    %118 = tpu.matmul %117, %14, %cst_28 {dimension_numbers = #tpu.dot_dimension_numbers<[1], [0], [0], [1], [0, 0, 1, 1], [], []>} : vector<16x32xbf16>, vector<32x64xbf16>, vector<16x64xf32> -> vector<16x64xf32>
    %119 = vector.broadcast %18 : vector<1x64xf32> to vector<16x64xf32>
    %120 = arith.addf %118, %119 : vector<16x64xf32>
    %cst_29 = arith.constant 0.000000e+00 : f32
    %121 = vector.broadcast %cst_29 : f32 to vector<16x64xf32>
    %122 = arith.maximumf %120, %121 : vector<16x64xf32>
    %123 = arith.truncf %122 : vector<16x64xf32> to vector<16x64xbf16>
    %cst_30 = arith.constant dense<0.000000e+00> : vector<16x32xf32>
    %124 = tpu.matmul %123, %15, %cst_30 {dimension_numbers = #tpu.dot_dimension_numbers<[1], [0], [0], [1], [0, 0, 1, 1], [], []>} : vector<16x64xbf16>, vector<64x32xbf16>, vector<16x32xf32> -> vector<16x32xf32>
    %125 = vector.broadcast %19 : vector<1x32xf32> to vector<16x32xf32>
    %126 = arith.addf %124, %125 : vector<16x32xf32>
    %127 = arith.addf %116, %126 : vector<16x32xf32>
    %cst_31 = arith.constant dense<0.000000e+00> : vector<16xf32>
    %128 = vector.multi_reduction <add>, %127, %cst_31 [1] : vector<16x32xf32> to vector<16xf32>
    %129 = vector.shape_cast %128 : vector<16xf32> to vector<16x1xf32>
    %cst_32 = arith.constant 3.200000e+01 : f32
    %130 = vector.broadcast %cst_32 : f32 to vector<16x1xf32>
    %131 = arith.divf %129, %130 : vector<16x1xf32>
    %132 = vector.broadcast %131 : vector<16x1xf32> to vector<16x32xf32>
    %133 = arith.subf %127, %132 : vector<16x32xf32>
    %134 = arith.mulf %133, %133 : vector<16x32xf32>
    %cst_33 = arith.constant dense<0.000000e+00> : vector<16xf32>
    %135 = vector.multi_reduction <add>, %134, %cst_33 [1] : vector<16x32xf32> to vector<16xf32>
    %136 = vector.shape_cast %135 : vector<16xf32> to vector<16x1xf32>
    %cst_34 = arith.constant 3.200000e+01 : f32
    %137 = vector.broadcast %cst_34 : f32 to vector<16x1xf32>
    %138 = arith.divf %136, %137 : vector<16x1xf32>
    %139 = vector.broadcast %131 : vector<16x1xf32> to vector<16x32xf32>
    %140 = arith.subf %127, %139 : vector<16x32xf32>
    %cst_35 = arith.constant 9.99999997E-7 : f32
    %141 = vector.broadcast %cst_35 : f32 to vector<16x1xf32>
    %142 = arith.addf %138, %141 : vector<16x1xf32>
    %143 = math.rsqrt %142 : vector<16x1xf32>
    %144 = vector.broadcast %143 : vector<16x1xf32> to vector<16x32xf32>
    %145 = arith.mulf %140, %144 : vector<16x32xf32>
    %146 = vector.broadcast %22 : vector<1x32xf32> to vector<16x32xf32>
    %147 = arith.mulf %145, %146 : vector<16x32xf32>
    %148 = vector.broadcast %23 : vector<1x32xf32> to vector<16x32xf32>
    %149 = arith.addf %147, %148 : vector<16x32xf32>
    %c160 = arith.constant 160 : index
    %c0_36 = arith.constant 0 : index
    %150 = vector.load %arg1[%c160, %c0_36] : memref<352x128xbf16, #tpu.memory_space<vmem>>, vector<32x96xbf16>
    %c192 = arith.constant 192 : index
    %c0_37 = arith.constant 0 : index
    %151 = vector.load %arg1[%c192, %c0_37] : memref<352x128xbf16, #tpu.memory_space<vmem>>, vector<32x32xbf16>
    %152 = vector.shape_cast %151 : vector<32x32xbf16> to vector<4x8x32xbf16>
    %c224 = arith.constant 224 : index
    %c0_38 = arith.constant 0 : index
    %153 = vector.load %arg1[%c224, %c0_38] : memref<352x128xbf16, #tpu.memory_space<vmem>>, vector<32x64xbf16>
    %c256 = arith.constant 256 : index
    %c0_39 = arith.constant 0 : index
    %154 = vector.load %arg1[%c256, %c0_39] : memref<352x128xbf16, #tpu.memory_space<vmem>>, vector<64x32xbf16>
    %c16 = arith.constant 16 : index
    %c0_40 = arith.constant 0 : index
    %155 = vector.load %arg2[%c16, %c0_40] : memref<25x128xf32, #tpu.memory_space<vmem>>, vector<1x96xf32>
    %c17 = arith.constant 17 : index
    %c0_41 = arith.constant 0 : index
    %156 = vector.load %arg2[%c17, %c0_41] : memref<25x128xf32, #tpu.memory_space<vmem>>, vector<1x32xf32>
    %c18 = arith.constant 18 : index
    %c0_42 = arith.constant 0 : index
    %157 = vector.load %arg2[%c18, %c0_42] : memref<25x128xf32, #tpu.memory_space<vmem>>, vector<1x64xf32>
    %c19 = arith.constant 19 : index
    %c0_43 = arith.constant 0 : index
    %158 = vector.load %arg2[%c19, %c0_43] : memref<25x128xf32, #tpu.memory_space<vmem>>, vector<1x32xf32>
    %c20 = arith.constant 20 : index
    %c0_44 = arith.constant 0 : index
    %159 = vector.load %arg2[%c20, %c0_44] : memref<25x128xf32, #tpu.memory_space<vmem>>, vector<1x32xf32>
    %c21 = arith.constant 21 : index
    %c0_45 = arith.constant 0 : index
    %160 = vector.load %arg2[%c21, %c0_45] : memref<25x128xf32, #tpu.memory_space<vmem>>, vector<1x32xf32>
    %c22 = arith.constant 22 : index
    %c0_46 = arith.constant 0 : index
    %161 = vector.load %arg2[%c22, %c0_46] : memref<25x128xf32, #tpu.memory_space<vmem>>, vector<1x32xf32>
    %c23 = arith.constant 23 : index
    %c0_47 = arith.constant 0 : index
    %162 = vector.load %arg2[%c23, %c0_47] : memref<25x128xf32, #tpu.memory_space<vmem>>, vector<1x32xf32>
    %163 = arith.truncf %149 : vector<16x32xf32> to vector<16x32xbf16>
    %cst_48 = arith.constant dense<0.000000e+00> : vector<16x96xf32>
    %164 = tpu.matmul %163, %150, %cst_48 {dimension_numbers = #tpu.dot_dimension_numbers<[1], [0], [0], [1], [0, 0, 1, 1], [], []>} : vector<16x32xbf16>, vector<32x96xbf16>, vector<16x96xf32> -> vector<16x96xf32>
    %165 = vector.broadcast %155 : vector<1x96xf32> to vector<16x96xf32>
    %166 = arith.addf %164, %165 : vector<16x96xf32>
    %167 = vector.extract_strided_slice %166 {offsets = [0, 0], sizes = [16, 8], strides = [1, 1]} : vector<16x96xf32> to vector<16x8xf32>
    %168 = vector.shape_cast %167 : vector<16x8xf32> to vector<2x8x8xf32>
    %169 = vector.extract_strided_slice %166 {offsets = [0, 8], sizes = [16, 8], strides = [1, 1]} : vector<16x96xf32> to vector<16x8xf32>
    %170 = vector.shape_cast %169 : vector<16x8xf32> to vector<2x8x8xf32>
    %171 = vector.extract_strided_slice %166 {offsets = [0, 16], sizes = [16, 8], strides = [1, 1]} : vector<16x96xf32> to vector<16x8xf32>
    %172 = vector.shape_cast %171 : vector<16x8xf32> to vector<2x8x8xf32>
    %173 = vector.extract_strided_slice %166 {offsets = [0, 24], sizes = [16, 8], strides = [1, 1]} : vector<16x96xf32> to vector<16x8xf32>
    %174 = vector.shape_cast %173 : vector<16x8xf32> to vector<2x8x8xf32>
    %175 = tpu.concatenate %168, %170, %172, %174 in 0 : vector<2x8x8xf32>, vector<2x8x8xf32>, vector<2x8x8xf32>, vector<2x8x8xf32> -> vector<8x8x8xf32>
    %176 = arith.truncf %175 : vector<8x8x8xf32> to vector<8x8x8xbf16>
    %177 = vector.extract_strided_slice %166 {offsets = [0, 32], sizes = [16, 8], strides = [1, 1]} : vector<16x96xf32> to vector<16x8xf32>
    %178 = vector.shape_cast %177 : vector<16x8xf32> to vector<2x8x8xf32>
    %179 = vector.extract_strided_slice %166 {offsets = [0, 40], sizes = [16, 8], strides = [1, 1]} : vector<16x96xf32> to vector<16x8xf32>
    %180 = vector.shape_cast %179 : vector<16x8xf32> to vector<2x8x8xf32>
    %181 = vector.extract_strided_slice %166 {offsets = [0, 48], sizes = [16, 8], strides = [1, 1]} : vector<16x96xf32> to vector<16x8xf32>
    %182 = vector.shape_cast %181 : vector<16x8xf32> to vector<2x8x8xf32>
    %183 = vector.extract_strided_slice %166 {offsets = [0, 56], sizes = [16, 8], strides = [1, 1]} : vector<16x96xf32> to vector<16x8xf32>
    %184 = vector.shape_cast %183 : vector<16x8xf32> to vector<2x8x8xf32>
    %185 = tpu.concatenate %178, %180, %182, %184 in 0 : vector<2x8x8xf32>, vector<2x8x8xf32>, vector<2x8x8xf32>, vector<2x8x8xf32> -> vector<8x8x8xf32>
    %186 = arith.truncf %185 : vector<8x8x8xf32> to vector<8x8x8xbf16>
    %187 = vector.extract_strided_slice %166 {offsets = [0, 64], sizes = [16, 8], strides = [1, 1]} : vector<16x96xf32> to vector<16x8xf32>
    %188 = vector.shape_cast %187 : vector<16x8xf32> to vector<2x8x8xf32>
    %189 = vector.extract_strided_slice %166 {offsets = [0, 72], sizes = [16, 8], strides = [1, 1]} : vector<16x96xf32> to vector<16x8xf32>
    %190 = vector.shape_cast %189 : vector<16x8xf32> to vector<2x8x8xf32>
    %191 = vector.extract_strided_slice %166 {offsets = [0, 80], sizes = [16, 8], strides = [1, 1]} : vector<16x96xf32> to vector<16x8xf32>
    %192 = vector.shape_cast %191 : vector<16x8xf32> to vector<2x8x8xf32>
    %193 = vector.extract_strided_slice %166 {offsets = [0, 88], sizes = [16, 8], strides = [1, 1]} : vector<16x96xf32> to vector<16x8xf32>
    %194 = vector.shape_cast %193 : vector<16x8xf32> to vector<2x8x8xf32>
    %195 = tpu.concatenate %188, %190, %192, %194 in 0 : vector<2x8x8xf32>, vector<2x8x8xf32>, vector<2x8x8xf32>, vector<2x8x8xf32> -> vector<8x8x8xf32>
    %196 = arith.truncf %195 : vector<8x8x8xf32> to vector<8x8x8xbf16>
    "tpu.trace_start"() <{level = 10 : i32, message = "bqd,bkd->bqk"}> : () -> ()
    %cst_49 = arith.constant dense<0.000000e+00> : vector<8x8x8xf32>
    %197 = tpu.matmul %176, %186, %cst_49 {dimension_numbers = #tpu.dot_dimension_numbers<[2], [2], [1], [1], [0, 0, 0, 1, 1, 1], [0], [0]>} : vector<8x8x8xbf16>, vector<8x8x8xbf16>, vector<8x8x8xf32> -> vector<8x8x8xf32>
    "tpu.trace_stop"() : () -> ()
    %cst_50 = arith.constant 0.353553385 : f32
    %198 = vector.broadcast %cst_50 : f32 to vector<8x8x8xf32>
    %199 = arith.mulf %197, %198 : vector<8x8x8xf32>
    %200 = vector.shape_cast %199 : vector<8x8x8xf32> to vector<4x16x8xf32>
    %201 = vector.shape_cast %8 : vector<16x8xf32> to vector<1x16x8xf32>
    %202 = vector.broadcast %201 : vector<1x16x8xf32> to vector<4x16x8xf32>
    %203 = arith.addf %200, %202 : vector<4x16x8xf32>
    %cst_51 = arith.constant dense<0xFF800000> : vector<4x16xf32>
    %204 = vector.multi_reduction <maximumf>, %203, %cst_51 [2] : vector<4x16x8xf32> to vector<4x16xf32>
    %205 = vector.shape_cast %204 : vector<4x16xf32> to vector<4x16x1xf32>
    %206 = vector.broadcast %205 : vector<4x16x1xf32> to vector<4x16x8xf32>
    %207 = arith.subf %203, %206 : vector<4x16x8xf32>
    %208 = math.exp %207 : vector<4x16x8xf32>
    %cst_52 = arith.constant dense<0.000000e+00> : vector<4x16xf32>
    %209 = vector.multi_reduction <add>, %208, %cst_52 [2] : vector<4x16x8xf32> to vector<4x16xf32>
    %210 = vector.shape_cast %209 : vector<4x16xf32> to vector<4x16x1xf32>
    %211 = tpu.reciprocal %210 {approx = true} : vector<4x16x1xf32> -> vector<4x16x1xf32>
    %212 = vector.broadcast %211 : vector<4x16x1xf32> to vector<4x16x8xf32>
    %213 = arith.mulf %208, %212 : vector<4x16x8xf32>
    %214 = vector.shape_cast %213 : vector<4x16x8xf32> to vector<8x8x8xf32>
    %215 = arith.truncf %214 : vector<8x8x8xf32> to vector<8x8x8xbf16>
    "tpu.trace_start"() <{level = 10 : i32, message = "bqk,bkd->bqd"}> : () -> ()
    %cst_53 = arith.constant dense<0.000000e+00> : vector<8x8x8xf32>
    %216 = tpu.matmul %215, %196, %cst_53 {dimension_numbers = #tpu.dot_dimension_numbers<[2], [1], [1], [2], [0, 0, 0, 1, 1, 2], [0], [0]>} : vector<8x8x8xbf16>, vector<8x8x8xbf16>, vector<8x8x8xf32> -> vector<8x8x8xf32>
    "tpu.trace_stop"() : () -> ()
    %217 = vector.shape_cast %216 : vector<8x8x8xf32> to vector<4x16x8xf32>
    %218 = arith.truncf %217 : vector<4x16x8xf32> to vector<4x16x8xbf16>
    "tpu.trace_start"() <{level = 10 : i32, message = "hmd,hdn->hmn"}> : () -> ()
    %cst_54 = arith.constant dense<0.000000e+00> : vector<4x16x32xf32>
    %219 = tpu.matmul %218, %152, %cst_54 {dimension_numbers = #tpu.dot_dimension_numbers<[2], [1], [1], [2], [0, 0, 0, 1, 1, 2], [0], [0]>} : vector<4x16x8xbf16>, vector<4x8x32xbf16>, vector<4x16x32xf32> -> vector<4x16x32xf32>
    "tpu.trace_stop"() : () -> ()
    %220 = vector.extract_strided_slice %219 {offsets = [0, 0, 0], sizes = [1, 16, 32], strides = [1, 1, 1]} : vector<4x16x32xf32> to vector<1x16x32xf32>
    %221 = vector.shape_cast %220 : vector<1x16x32xf32> to vector<16x32xf32>
    %222 = vector.broadcast %156 : vector<1x32xf32> to vector<16x32xf32>
    %223 = arith.addf %222, %221 : vector<16x32xf32>
    %224 = vector.extract_strided_slice %219 {offsets = [1, 0, 0], sizes = [1, 16, 32], strides = [1, 1, 1]} : vector<4x16x32xf32> to vector<1x16x32xf32>
    %225 = vector.shape_cast %224 : vector<1x16x32xf32> to vector<16x32xf32>
    %226 = arith.addf %223, %225 : vector<16x32xf32>
    %227 = vector.extract_strided_slice %219 {offsets = [2, 0, 0], sizes = [1, 16, 32], strides = [1, 1, 1]} : vector<4x16x32xf32> to vector<1x16x32xf32>
    %228 = vector.shape_cast %227 : vector<1x16x32xf32> to vector<16x32xf32>
    %229 = arith.addf %226, %228 : vector<16x32xf32>
    %230 = vector.extract_strided_slice %219 {offsets = [3, 0, 0], sizes = [1, 16, 32], strides = [1, 1, 1]} : vector<4x16x32xf32> to vector<1x16x32xf32>
    %231 = vector.shape_cast %230 : vector<1x16x32xf32> to vector<16x32xf32>
    %232 = arith.addf %229, %231 : vector<16x32xf32>
    %233 = arith.addf %149, %232 : vector<16x32xf32>
    %cst_55 = arith.constant dense<0.000000e+00> : vector<16xf32>
    %234 = vector.multi_reduction <add>, %233, %cst_55 [1] : vector<16x32xf32> to vector<16xf32>
    %235 = vector.shape_cast %234 : vector<16xf32> to vector<16x1xf32>
    %cst_56 = arith.constant 3.200000e+01 : f32
    %236 = vector.broadcast %cst_56 : f32 to vector<16x1xf32>
    %237 = arith.divf %235, %236 : vector<16x1xf32>
    %238 = vector.broadcast %237 : vector<16x1xf32> to vector<16x32xf32>
    %239 = arith.subf %233, %238 : vector<16x32xf32>
    %240 = arith.mulf %239, %239 : vector<16x32xf32>
    %cst_57 = arith.constant dense<0.000000e+00> : vector<16xf32>
    %241 = vector.multi_reduction <add>, %240, %cst_57 [1] : vector<16x32xf32> to vector<16xf32>
    %242 = vector.shape_cast %241 : vector<16xf32> to vector<16x1xf32>
    %cst_58 = arith.constant 3.200000e+01 : f32
    %243 = vector.broadcast %cst_58 : f32 to vector<16x1xf32>
    %244 = arith.divf %242, %243 : vector<16x1xf32>
    %245 = vector.broadcast %237 : vector<16x1xf32> to vector<16x32xf32>
    %246 = arith.subf %233, %245 : vector<16x32xf32>
    %cst_59 = arith.constant 9.99999997E-7 : f32
    %247 = vector.broadcast %cst_59 : f32 to vector<16x1xf32>
    %248 = arith.addf %244, %247 : vector<16x1xf32>
    %249 = math.rsqrt %248 : vector<16x1xf32>
    %250 = vector.broadcast %249 : vector<16x1xf32> to vector<16x32xf32>
    %251 = arith.mulf %246, %250 : vector<16x32xf32>
    %252 = vector.broadcast %159 : vector<1x32xf32> to vector<16x32xf32>
    %253 = arith.mulf %251, %252 : vector<16x32xf32>
    %254 = vector.broadcast %160 : vector<1x32xf32> to vector<16x32xf32>
    %255 = arith.addf %253, %254 : vector<16x32xf32>
    %256 = arith.truncf %255 : vector<16x32xf32> to vector<16x32xbf16>
    %cst_60 = arith.constant dense<0.000000e+00> : vector<16x64xf32>
    %257 = tpu.matmul %256, %153, %cst_60 {dimension_numbers = #tpu.dot_dimension_numbers<[1], [0], [0], [1], [0, 0, 1, 1], [], []>} : vector<16x32xbf16>, vector<32x64xbf16>, vector<16x64xf32> -> vector<16x64xf32>
    %258 = vector.broadcast %157 : vector<1x64xf32> to vector<16x64xf32>
    %259 = arith.addf %257, %258 : vector<16x64xf32>
    %cst_61 = arith.constant 0.000000e+00 : f32
    %260 = vector.broadcast %cst_61 : f32 to vector<16x64xf32>
    %261 = arith.maximumf %259, %260 : vector<16x64xf32>
    %262 = arith.truncf %261 : vector<16x64xf32> to vector<16x64xbf16>
    %cst_62 = arith.constant dense<0.000000e+00> : vector<16x32xf32>
    %263 = tpu.matmul %262, %154, %cst_62 {dimension_numbers = #tpu.dot_dimension_numbers<[1], [0], [0], [1], [0, 0, 1, 1], [], []>} : vector<16x64xbf16>, vector<64x32xbf16>, vector<16x32xf32> -> vector<16x32xf32>
    %264 = vector.broadcast %158 : vector<1x32xf32> to vector<16x32xf32>
    %265 = arith.addf %263, %264 : vector<16x32xf32>
    %266 = arith.addf %255, %265 : vector<16x32xf32>
    %cst_63 = arith.constant dense<0.000000e+00> : vector<16xf32>
    %267 = vector.multi_reduction <add>, %266, %cst_63 [1] : vector<16x32xf32> to vector<16xf32>
    %268 = vector.shape_cast %267 : vector<16xf32> to vector<16x1xf32>
    %cst_64 = arith.constant 3.200000e+01 : f32
    %269 = vector.broadcast %cst_64 : f32 to vector<16x1xf32>
    %270 = arith.divf %268, %269 : vector<16x1xf32>
    %271 = vector.broadcast %270 : vector<16x1xf32> to vector<16x32xf32>
    %272 = arith.subf %266, %271 : vector<16x32xf32>
    %273 = arith.mulf %272, %272 : vector<16x32xf32>
    %cst_65 = arith.constant dense<0.000000e+00> : vector<16xf32>
    %274 = vector.multi_reduction <add>, %273, %cst_65 [1] : vector<16x32xf32> to vector<16xf32>
    %275 = vector.shape_cast %274 : vector<16xf32> to vector<16x1xf32>
    %cst_66 = arith.constant 3.200000e+01 : f32
    %276 = vector.broadcast %cst_66 : f32 to vector<16x1xf32>
    %277 = arith.divf %275, %276 : vector<16x1xf32>
    %278 = vector.broadcast %270 : vector<16x1xf32> to vector<16x32xf32>
    %279 = arith.subf %266, %278 : vector<16x32xf32>
    %cst_67 = arith.constant 9.99999997E-7 : f32
    %280 = vector.broadcast %cst_67 : f32 to vector<16x1xf32>
    %281 = arith.addf %277, %280 : vector<16x1xf32>
    %282 = math.rsqrt %281 : vector<16x1xf32>
    %283 = vector.broadcast %282 : vector<16x1xf32> to vector<16x32xf32>
    %284 = arith.mulf %279, %283 : vector<16x32xf32>
    %285 = vector.broadcast %161 : vector<1x32xf32> to vector<16x32xf32>
    %286 = arith.mulf %284, %285 : vector<16x32xf32>
    %287 = vector.broadcast %162 : vector<1x32xf32> to vector<16x32xf32>
    %288 = arith.addf %286, %287 : vector<16x32xf32>
    %c320 = arith.constant 320 : index
    %c0_68 = arith.constant 0 : index
    %289 = vector.load %arg1[%c320, %c0_68] : memref<352x128xbf16, #tpu.memory_space<vmem>>, vector<32x128xbf16>
    %c24 = arith.constant 24 : index
    %c0_69 = arith.constant 0 : index
    %290 = vector.load %arg2[%c24, %c0_69] : memref<25x128xf32, #tpu.memory_space<vmem>>, vector<1x1xf32>
    %291 = arith.truncf %288 : vector<16x32xf32> to vector<16x32xbf16>
    %cst_70 = arith.constant dense<0.000000e+00> : vector<16x128xf32>
    %292 = tpu.matmul %291, %289, %cst_70 {dimension_numbers = #tpu.dot_dimension_numbers<[1], [0], [0], [1], [0, 0, 1, 1], [], []>} : vector<16x32xbf16>, vector<32x128xbf16>, vector<16x128xf32> -> vector<16x128xf32>
    %293 = vector.broadcast %290 : vector<1x1xf32> to vector<16x128xf32>
    %294 = arith.addf %292, %293 : vector<16x128xf32>
    %295 = vector.broadcast %10 : vector<16x1xf32> to vector<16x128xf32>
    %296 = arith.addf %294, %295 : vector<16x128xf32>
    %297 = math.exp %296 : vector<16x128xf32>
    %c0_71 = arith.constant 0 : index
    %c0_72 = arith.constant 0 : index
    %298 = vector.load %arg3[%c0_71, %c0_72] : memref<16x128xf32, #tpu.memory_space<vmem>>, vector<16x128xf32>
    tpu.vector_store %arg3[%c0_71, %c0_72], %297 {strides = array<i32>} : memref<16x128xf32, #tpu.memory_space<vmem>>, vector<16x128xf32>,
    return
  }
}

</mosaic_0001>

<bundles_post_ra>
// kernel: squeeze.1
= control target key start
LH: loop header
LB: loop body
LE: loop exit
PB: predicated region body
PF: predicated region fallthrough
CT: control target
= control target key end

     0   :  { %s85_s0 = inlined_call_operand.vmem [shape: f32[16], index: 0, kind: input, shape index: {}]   ;;  %s86_s1 = inlined_call_operand.hbm [shape: f32[2,8], index: 1, kind: output, shape index: {}]  }
   0x1   :  { %v5_v0 = vld [vmem:[%s85_s0] sm:$0x1] }
   0x2   :  { %2 = vsyncpa [#allocation1], 0  ;;  %6 = vst [vmem:[#allocation3] sm:$0x1] %v5_v0  ;;  %vm8_vm0 = vcmask 64512   ;;  %s58_s0 = smov 120  }
   0x3   :  { %s59_s8 = smov [#allocation0]  }
   0x4   :  { %s26_s9 = sshll.u32 %s59_s8, 4  ;;  %s27_s9 = int_to_ptr.vmem [resolvable:$true] %s26_s9 }
   0x5   :  { %s34_s10 = scalar_lea.vmem %s27_s9, 32  ;;  %p39_p1 = scmp.lt.s32.totalorder %s27_s9, %s27_s9 }
   0x6   :  { %p35_p0 = scmp.ne.s32.totalorder %s27_s9, %s34_s10  ;;  %p40_p2 = scmp.lt.s32.totalorder %s34_s10, %s34_s10 }
   0x8   :  { %p41_p3 = por %p40_p2, %p39_p1 }
   0x9   :  { %v10_v1 = vld [vmem:[#allocation3] sm:$0x1]  }
   0xa   :  { %v7_v2 = vld [vmem:[#allocation3] sm:$0x1]   ;;  %11 = vrot.lane.b32.xlu0 %v10_v1, %s58_s0  ;;  %p42_p4 = pnand %p41_p3, %p35_p0 }
   0xb   :  { %9 = vst.msk [vmem:[#allocation2] sm:$0x1] %vm8_vm0, %v7_v2  }
  0x7c   :  { %v12_v3 = vpop.permute.xlu0 %11  }
  0x7d   :  { %15 = vst.msk [vmem:[#allocation2 + $0x1] sm:$0x1] %vm8_vm0, %v12_v3  }
  0x84   :  { %v19_v4 = vld [vmem:[#allocation2] sm:$0x3] }
  0x85   :  { %21 = vst [vmem:[#allocation0] sm:$0x3] %v19_v4 }
  0x86   :  { %45 = shalt.err (!%p42_p4)
}
  0x87   :  { %s46_s13 = scalar_lea.hbm %s86_s1, 32 }
  0x88   :  { %p47_p5 = scmp.ne.s32.totalorder %s86_s1, %s46_s13  ;;  %p50_p6 = scmp.lt.u32.totalorder %s46_s13, %s86_s1 }
  0x8a   :  { %p52_p7 = pnand %p50_p6, %p47_p5 }
  0x8c   :  { %55 = shalt.err (!%p52_p7)
}
  0x8d   :  { %29 = dma.vmem_to_hbm [thread:$0]  %s27_s9, 32, %s86_s1, [#allocation1]  }
  0x8e   :  { %56 = dma.done.wait [#allocation1], 32  }
  0x8f   :  { %57 = vsyncadd [#allocation1], 4294967264 }
  0x90   :  { %31 = vsyncpa [#allocation1], 1 }

// kernel: pre_att_model_forward.1
= control target key start
LH: loop header
LB: loop body
LE: loop exit
PB: predicated region body
PF: predicated region fallthrough
CT: control target
= control target key end

     0   :  { %8 = vsyncpa [#allocation3], 0  ;;  %s3646_s12 = smov [#allocation2]   ;;  %s4270_s0 = inlined_call_operand.vmem [shape: f32[2,8,41], index: 0, kind: input, shape index: {}]   ;;  %s4271_s1 = inlined_call_operand.hbm [shape: bf16[352,128], index: 1, kind: input, shape index: {}]   ;;  %s4272_s2 = inlined_call_operand.vmem [shape: f32[25,128], index: 2, kind: input, shape index: {}]   ;;  %s4273_s3 = inlined_call_operand.vmem [shape: f32[16,128], index: 3, kind: output, shape index: {}]  }
   0x1   :  { %s16_s13 = sshll.u32 %s3646_s12, 4  ;;  %s3622_s16 = scalar_lea.hbm %s4271_s1, 2816  ;;  %s17_s13 = int_to_ptr.vmem [resolvable:$true] %s16_s13 }
   0x2   :  { %p3623_p0 = scmp.ne.s32.totalorder %s4271_s1, %s3622_s16  ;;  %p3626_p1 = scmp.lt.u32.totalorder %s3622_s16, %s4271_s1 }
   0x4   :  { %p3628_p2 = pnand %p3626_p1, %p3623_p0 }
   0x6   :  { %3631 = shalt.err (!%p3628_p2)
}
   0x7   :  { %s3632_s21 = scalar_lea.vmem %s17_s13, 2816  ;;  %p3637_p4 = scmp.lt.s32.totalorder %s17_s13, %s17_s13 }
   0x8   :  { %p3633_p3 = scmp.ne.s32.totalorder %s17_s13, %s3632_s21  ;;  %p3638_p5 = scmp.lt.s32.totalorder %s3632_s21, %s3632_s21 }
   0xa   :  { %p3639_p6 = por %p3638_p5, %p3637_p4 }
   0xc   :  { %p3640_p7 = pnand %p3639_p6, %p3633_p3 }
   0xe   :  { %3643 = shalt.err (!%p3640_p7)
}
   0xf   :  { %s3647_s22 = smov 64   ;;  %s3648_s23 = smov 4  }
  0x10   :  { %22 = dma.hbm_to_vmem [thread:$0]  %s4271_s1, 2816, %s17_s13, [#allocation3], %s3647_s22, %s3647_s22, %s3648_s23  }
  0x11   :  { %3644 = dma.done.wait [#allocation3], 2816  }
  0x12   :  { %3645 = vsyncadd [#allocation3], 4294964480  ;;  %v3649_v0 = vmov 0.0   ;;  %vm3650_vm0 = vmmov 0   ;;  %v3518_v1 = vld [vmem:[#allocation2] sm:$0xff]   ;;  %v3519_v2 = vld [vmem:[#allocation2 + $0x8] sm:$0xff]  }
  0x13   :  { %3170 = vmatprep.subr.bf16.mxu0 %v3649_v0  ;;  %3174 = vmatprep.mubr.msk.bf16.mxu0 %vm3650_vm0, %v3649_v0  ;;  %v3699_v3 = vld [vmem:[%s4270_s0] sm:$0xff]  ;;  %v3704_v4 = vld [vmem:[%s4270_s0 + $0x8] sm:$0xff]  ;;  %vm79_vm1 = vcmask 261120   ;;  %s3651_s6 = smov 104   ;;  %s3652_s7 = smov 120   ;;  %vm155_vm2 = vcmask 64512  }
  0x14   :  { %3178 = vmatprep.subr.bf16.mxu1 %v3649_v0  ;;  %3180 = vmatprep.mubr.msk.bf16.mxu1 %vm3650_vm0, %v3649_v0  ;;  %v31_v5 = vld [vmem:[%s4272_s2] sm:$0xff]  ;;  %v2984_v9 = vld [vmem:[%s4272_s2 + $0x8] ss:$0 sm:$0xff]  ;;  %s3653_s8 = smov 96   ;;  %s3654_s9 = smov 112   ;;  %vm670_vm3 = vcmask 1043456  }
  0x15   :  { %3171 = vmatpush3.bf16.msra.mxu0 %v3518_v1  ;;  %v3711_v6 = vadd.f32 %v31_v5, %v3699_v3  ;;  %v3714_v7 = vadd.f32 %v31_v5, %v3704_v4  ;;  %vm1387_vm4 = vcmask 523264  }
  0x16   :  { %3172 = vmatprep.subr.bf16.mxu0 %v3649_v0 }
  0x17   :  { %v62_v8 = vpack.c.bf16 %v3714_v7, %v3711_v6 }
  0x19   :  { %3173 = vmatpush3.bf16.msra.mxu0 %v3519_v2 }
  0x1a   :  { %3184 = vmatprep.subr.bf16.mxu0 %v3649_v0 }
  0x1c   :  { %3175 = vmatmul.mubr.msk.bf16.vlgmr.msra.gmra.mrb[0].mxu0 %vm79_vm1, %v62_v8 }
  0x1d   :  { %3186 = vmatprep.mubr.msk.bf16.mxu0 %vm3650_vm0, %v3649_v0 }
  0xef   :  { %v117_v10 = vpop.f32.mrb[0].mxu0 }
  0xf0   :  { %v3176_v11 = vpop.f32.mrb[1].mxu0  ;;  %v118_v13 = vadd.f32 %v2984_v9, %v117_v10 }
  0xf1   :  { %v120_v12 = vpop.f32.mrb[2].mxu0 }
  0xf2   :  { %v121_v14 = vadd.f32 %v2984_v9, %v120_v12  ;;  %v3177_v15 = vpop.f32.mrb[3].mxu0  ;;  %v144_v17 = vpack.c.bf16 %v118_v13, %v118_v13 }
  0xf4   :  { %v3496_v16 = vpack.i.bf16 %v121_v14, %v118_v13  ;;  %v145_v18 = vpack.c.bf16 %v121_v14, %v121_v14 }
  0xf6   :  { %3497 = vrot.lane.b32.xlu1 %v3496_v16, %s3651_s6  ;;  %3487 = vrot.lane.b32.xlu0 %v3496_v16, %s3652_s7 }
  0xfa   :  { %153 = vrot.lane.b32.xlu1 %v144_v17, %s3653_s8  ;;  %3492 = vrot.lane.b32.xlu0 %v3496_v16, %s3654_s9 }
  0xfe   :  { %203 = vrot.lane.b32.xlu0 %v145_v18, %s3653_s8 }
 0x168   :  { %v3498_v19 = vpop.permute.xlu1 %3497  ;;  %v3488_v20 = vpop.permute.xlu0 %3487 }
 0x169   :  { %v3490_v21 = vunpack.i.h.bf16 %v3488_v20  ;;  %v3489_v22 = vunpack.i.l.bf16 %v3488_v20  ;;  %v3499_v30 = vunpack.i.l.bf16 %v3498_v19  ;;  %v3500_v33 = vunpack.i.h.bf16 %v3498_v19 }
 0x16b   :  { %v3730_v23 = vpack.c.bf16 %v3490_v21, %v3490_v21  ;;  %v3732_v24 = vpack.c.bf16 %v3489_v22, %v3489_v22  ;;  %v3749_v36 = vpack.c.bf16 %v3499_v30, %v3499_v30  ;;  %v3752_v37 = vpack.c.bf16 %v3500_v33, %v3500_v33 }
 0x16c   :  { %v154_v25 = vpop.permute.xlu1 %153  ;;  %v3493_v26 = vpop.permute.xlu0 %3492 }
 0x16d   :  { %v3495_v27 = vunpack.i.h.bf16 %v3493_v26  ;;  %v3494_v28 = vunpack.i.l.bf16 %v3493_v26  ;;  %252 = vrot.lane.b32.xlu1 %v3732_v24, %s3653_s8  ;;  %301 = vrot.lane.b32.xlu0 %v3730_v23, %s3653_s8  ;;  %v160_v29 = vsel %vm155_vm2, %v154_v25, 0 }
 0x16e   :  { %3179 = vmatpush3.bf16.xpose.msra.mxu1 %v160_v29 }
 0x16f   :  { %v3739_v31 = vpack.c.bf16 %v3495_v27, %v3495_v27  ;;  %v3741_v32 = vpack.c.bf16 %v3494_v28, %v3494_v28  ;;  %3190 = vmatprep.subr.bf16.mxu1 %v3649_v0 }
 0x170   :  { %v204_v34 = vpop.permute.xlu0 %203 }
 0x171   :  { %v209_v35 = vsel %vm155_vm2, %v204_v34, 0  ;;  %350 = vrot.lane.b32.xlu1 %v3741_v32, %s3653_s8  ;;  %399 = vrot.lane.b32.xlu0 %v3739_v31, %s3653_s8 }
 0x172   :  { %3185 = vmatpush3.bf16.xpose.msra.mxu0 %v209_v35 }
 0x173   :  { %3196 = vmatprep.subr.bf16.mxu0 %v3649_v0 }
 0x175   :  { %3181 = vmatmul.mubr.msk.bf16.vlgmr.msra.gmra.mrb[0].mxu1 %vm155_vm2, %v144_v17  ;;  %448 = vrot.lane.b32.xlu1 %v3749_v36, %s3653_s8 }
 0x176   :  { %497 = vrot.lane.b32.xlu0 %v3752_v37, %s3653_s8  ;;  %3192 = vmatprep.mubr.msk.bf16.mxu1 %vm3650_vm0, %v3649_v0 }
 0x179   :  { %555 = vrot.lane.b32.xlu1 %v3699_v3, %s3653_s8  ;;  %3187 = vmatmul.mubr.msk.bf16.vlgmr.msra.gmra.mrb[4].mxu0 %vm155_vm2, %v145_v18 }
 0x17a   :  { %557 = vrot.lane.b32.xlu0 %v3704_v4, %s3653_s8  ;;  %3198 = vmatprep.mubr.msk.bf16.mxu0 %vm3650_vm0, %v3649_v0 }
 0x17d   :  { %714 = vrot.lane.b32.xlu1 %v145_v18, %s3647_s22 }
 0x17e   :  { %665 = vrot.lane.b32.xlu0 %v144_v17, %s3647_s22 }
 0x1df   :  { %v253_v38 = vpop.permute.xlu1 %252  ;;  %v302_v39 = vpop.permute.xlu0 %301 }
 0x1e0   :  { %v258_v40 = vsel %vm155_vm2, %v253_v38, 0  ;;  %v307_v41 = vsel %vm155_vm2, %v302_v39, 0 }
 0x1e1   :  { %3191 = vmatpush3.bf16.xpose.msra.mxu1 %v258_v40  ;;  %3197 = vmatpush3.bf16.xpose.msra.mxu0 %v307_v41 }
 0x1e2   :  { %3202 = vmatprep.subr.bf16.mxu1 %v3649_v0  ;;  %3208 = vmatprep.subr.bf16.mxu0 %v3649_v0 }
 0x1e3   :  { %v351_v42 = vpop.permute.xlu1 %350  ;;  %v400_v43 = vpop.permute.xlu0 %399 }
 0x1e4   :  { %v356_v44 = vsel %vm155_vm2, %v351_v42, 0  ;;  %v405_v45 = vsel %vm155_vm2, %v400_v43, 0 }
 0x1e7   :  { %v449_v46 = vpop.permute.xlu1 %448 }
 0x1e8   :  { %3193 = vmatmul.mubr.msk.bf16.vlgmr.msra.gmra.mrb[4].mxu1 %vm155_vm2, %v3732_v24  ;;  %3199 = vmatmul.mubr.msk.bf16.vlgmr.msra.gmra.mrb[8].mxu0 %vm155_vm2, %v3730_v23  ;;  %v498_v47 = vpop.permute.xlu0 %497  ;;  %v454_v50 = vsel %vm155_vm2, %v449_v46, 0 }
 0x1e9   :  { %3203 = vmatpush3.bf16.xpose.msra.mxu1 %v356_v44  ;;  %3209 = vmatpush3.bf16.xpose.msra.mxu0 %v405_v45  ;;  %v503_v51 = vsel %vm155_vm2, %v498_v47, 0 }
 0x1ea   :  { %3204 = vmatprep.mubr.msk.bf16.mxu1 %vm3650_vm0, %v3649_v0  ;;  %3210 = vmatprep.mubr.msk.bf16.mxu0 %vm3650_vm0, %v3649_v0 }
 0x1eb   :  { %3214 = vmatprep.subr.bf16.mxu1 %v3649_v0  ;;  %3220 = vmatprep.subr.bf16.mxu0 %v3649_v0  ;;  %v3786_v48 = vpop.permute.xlu1 %555 }
 0x1ec   :  { %v3788_v49 = vpop.permute.xlu0 %557 }
 0x1ef   :  { %v715_v52 = vpop.permute.xlu1 %714 }
 0x1f0   :  { %3205 = vmatmul.mubr.msk.bf16.vlgmr.msra.gmra.mrb[8].mxu1 %vm155_vm2, %v3741_v32  ;;  %3211 = vmatmul.mubr.msk.bf16.vlgmr.msra.gmra.mrb[12].mxu0 %vm155_vm2, %v3739_v31  ;;  %v666_v53 = vpop.permute.xlu0 %665  ;;  %v720_v54 = vsel %vm670_vm3, %v715_v52, 0 }
 0x1f1   :  { %3215 = vmatpush3.bf16.xpose.msra.mxu1 %v454_v50  ;;  %3221 = vmatpush3.bf16.xpose.msra.mxu0 %v503_v51  ;;  %v672_v55 = vsel %vm670_vm3, %v666_v53, 0 }
 0x1f2   :  { %3216 = vmatprep.mubr.msk.bf16.mxu1 %vm3650_vm0, %v3649_v0  ;;  %3222 = vmatprep.mubr.msk.bf16.mxu0 %vm3650_vm0, %v3649_v0 }
 0x1f3   :  { %3226 = vmatprep.subr.bf16.mxu1 %v3649_v0  ;;  %3232 = vmatprep.subr.bf16.mxu0 %v3649_v0 }
 0x1f8   :  { %3217 = vmatmul.mubr.msk.bf16.vlgmr.msra.gmra.mrb[12].mxu1 %vm155_vm2, %v3749_v36  ;;  %3223 = vmatmul.mubr.msk.bf16.vlgmr.msra.gmra.mrb[16].mxu0 %vm155_vm2, %v3752_v37 }
 0x1f9   :  { %3227 = vmatpush3.bf16.msra.mxu1 %v672_v55  ;;  %3233 = vmatpush3.bf16.msra.mxu0 %v720_v54 }
 0x1fa   :  { %3228 = vmatprep.mubr.msk.bf16.mxu1 %vm3650_vm0, %v3649_v0  ;;  %3234 = vmatprep.mubr.msk.bf16.mxu0 %vm3650_vm0, %v3649_v0 }
 0x1fb   :  { %3238 = vmatprep.subr.bf16.mxu1 %v3649_v0  ;;  %3244 = vmatprep.subr.bf16.mxu0 %v3649_v0 }
 0x248   :  { %v196_v56 = vpop.f32.mrb[0].mxu1 }
 0x249   :  { %v545_v57 = vmul.f32 0.35355338, %v196_v56  ;;  %v3182_v58 = vpop.f32.mrb[1].mxu1 }
 0x24a   :  { %v199_v59 = vpop.f32.mrb[2].mxu1 }
 0x24b   :  { %v3183_v60 = vpop.f32.mrb[3].mxu1  ;;  %v3815_v61 = vadd.f32 %v3786_v48, %v545_v57 }
 0x24c   :  { %v245_v62 = vpop.f32.mrb[4].mxu0 }
 0x24d   :  { %v546_v63 = vmul.f32 0.35355338, %v245_v62  ;;  %v3188_v1 = vpop.f32.mrb[5].mxu0  ;;  %v569_v2 = vsel %vm155_vm2, %v3815_v61, -inf }
 0x24e   :  { %570 = vmax.xlane.f32.xlu1 %v569_v2  ;;  %v248_v3 = vpop.f32.mrb[6].mxu0 }
 0x24f   :  { %v3189_v4 = vpop.f32.mrb[7].mxu0  ;;  %v562_v5 = vadd.f32 %v3788_v49, %v546_v63 }
 0x251   :  { %v572_v8 = vsel %vm155_vm2, %v562_v5, -inf }
 0x252   :  { %573 = vmax.xlane.f32.xlu0 %v572_v8 }
 0x2bb   :  { %v294_v9 = vpop.f32.mrb[4].mxu1  ;;  %v343_v10 = vpop.f32.mrb[8].mxu0 }
 0x2bc   :  { %v547_v11 = vmul.f32 0.35355338, %v294_v9  ;;  %v548_v12 = vmul.f32 0.35355338, %v343_v10  ;;  %v3194_v13 = vpop.f32.mrb[5].mxu1  ;;  %v3200_v14 = vpop.f32.mrb[9].mxu0 }
 0x2bd   :  { %v297_v15 = vpop.f32.mrb[6].mxu1  ;;  %v346_v16 = vpop.f32.mrb[10].mxu0 }
 0x2be   :  { %v3195_v17 = vpop.f32.mrb[7].mxu1  ;;  %v3201_v18 = vpop.f32.mrb[11].mxu0  ;;  %v563_v19 = vadd.f32 %v3786_v48, %v547_v11  ;;  %v564_v20 = vadd.f32 %v3788_v49, %v548_v12 }
 0x2c0   :  { %v575_v21 = vsel %vm155_vm2, %v563_v19, -inf  ;;  %v578_v22 = vsel %vm155_vm2, %v564_v20, -inf }
 0x2c1   :  { %576 = vmax.xlane.f32.xlu0 %v575_v21  ;;  %579 = vmax.xlane.f32.xlu1 %v578_v22 }
 0x2c3   :  { %v392_v25 = vpop.f32.mrb[8].mxu1  ;;  %v441_v26 = vpop.f32.mrb[12].mxu0 }
 0x2c4   :  { %v549_v27 = vmul.f32 0.35355338, %v392_v25  ;;  %v550_v28 = vmul.f32 0.35355338, %v441_v26  ;;  %v3206_v29 = vpop.f32.mrb[9].mxu1  ;;  %v3212_v30 = vpop.f32.mrb[13].mxu0 }
 0x2c5   :  { %v395_v33 = vpop.f32.mrb[10].mxu1  ;;  %v444_v34 = vpop.f32.mrb[14].mxu0 }
 0x2c6   :  { %v3207_v35 = vpop.f32.mrb[11].mxu1  ;;  %v3213_v38 = vpop.f32.mrb[15].mxu0  ;;  %v3826_v39 = vadd.f32 %v3786_v48, %v549_v27  ;;  %v566_v40 = vadd.f32 %v3788_v49, %v550_v28 }
 0x2c8   :  { %v581_v41 = vsel %vm155_vm2, %v3826_v39, -inf  ;;  %v584_v42 = vsel %vm155_vm2, %v566_v40, -inf }
 0x2c9   :  { %582 = vmax.xlane.f32.xlu0 %v581_v41  ;;  %585 = vmax.xlane.f32.xlu1 %v584_v42 }
 0x2cb   :  { %v490_v43 = vpop.f32.mrb[12].mxu1  ;;  %v539_v44 = vpop.f32.mrb[16].mxu0 }
 0x2cc   :  { %v551_v45 = vmul.f32 0.35355338, %v490_v43  ;;  %v552_v46 = vmul.f32 0.35355338, %v539_v44  ;;  %v3218_v47 = vpop.f32.mrb[13].mxu1  ;;  %v3224_v50 = vpop.f32.mrb[17].mxu0 }
 0x2cd   :  { %v493_v51 = vpop.f32.mrb[14].mxu1  ;;  %v542_v52 = vpop.f32.mrb[18].mxu0 }
 0x2ce   :  { %v3219_v53 = vpop.f32.mrb[15].mxu1  ;;  %v3225_v54 = vpop.f32.mrb[19].mxu0  ;;  %v567_v55 = vadd.f32 %v3786_v48, %v551_v45  ;;  %v568_v56 = vadd.f32 %v3788_v49, %v552_v46 }
 0x2d0   :  { %v587_v57 = vsel %vm155_vm2, %v567_v55, -inf  ;;  %v590_v58 = vsel %vm155_vm2, %v568_v56, -inf }
 0x2d1   :  { %588 = vmax.xlane.f32.xlu0 %v587_v57  ;;  %591 = vmax.xlane.f32.xlu1 %v590_v58 }
 0x2db   :  { %v571_v59 = vpop.xlane.xlu1 %570 }
 0x2dc   :  { %v593_v62 = vsub.f32 %v3815_v61, %v571_v59 }
 0x2de   :  { %v601_v1 = vmul.f32 1.442695, %v593_v62 }
 0x2df   :  { %v574_v60 = vpop.xlane.xlu0 %573 }
 0x2e0   :  { %v594_v63 = vsub.f32 %v562_v5, %v574_v60  ;;  %3536 = vpow2.f32 %v601_v1 }
 0x2e2   :  { %762 = vrot.lane.b32.xlu1 %v3732_v24, %s3647_s22  ;;  %v603_v2 = vmul.f32 1.442695, %v594_v63 }
 0x2e4   :  { %3538 = vpow2.f32 %v603_v2 }
 0x2e7   :  { %810 = vrot.lane.b32.xlu0 %v3730_v23, %s3647_s22 }
 0x2ea   :  { %v3537_v3 = vpop.eup %3536 }
 0x2eb   :  { %v617_v8 = vsel %vm155_vm2, %v3537_v3, 0.0 }
 0x2ee   :  { %v3539_v4 = vpop.eup %3538 }
 0x2ef   :  { %v620_v9 = vsel %vm155_vm2, %v3539_v4, 0.0 }
 0x306   :  { %618 = vadd.xlane.f32.xlu0 %v617_v8  ;;  %621 = vadd.xlane.f32.xlu1 %v620_v9 }
 0x317   :  { %858 = vrot.lane.b32.xlu1 %v3741_v32, %s3647_s22 }
 0x34e   :  { %v577_v23 = vpop.xlane.xlu0 %576  ;;  %v580_v24 = vpop.xlane.xlu1 %579 }
 0x34f   :  { %v595_v10 = vsub.f32 %v563_v19, %v577_v23  ;;  %v596_v61 = vsub.f32 %v564_v20, %v580_v24 }
 0x351   :  { %v605_v5 = vmul.f32 1.442695, %v595_v10  ;;  %v607_v11 = vmul.f32 1.442695, %v596_v61 }
 0x353   :  { %3540 = vpow2.f32 %v605_v5 }
 0x354   :  { %3542 = vpow2.f32 %v607_v11 }
 0x356   :  { %v586_v12 = vpop.xlane.xlu1 %585  ;;  %v583_v27 = vpop.xlane.xlu0 %582 }
 0x357   :  { %v598_v13 = vsub.f32 %v566_v40, %v586_v12  ;;  %v597_v28 = vsub.f32 %v3826_v39, %v583_v27 }
 0x359   :  { %v611_v14 = vmul.f32 1.442695, %v598_v13  ;;  %v609_v30 = vmul.f32 1.442695, %v597_v28 }
 0x35b   :  { %3544 = vpow2.f32 %v611_v14 }
 0x35d   :  { %v3845_v15 = vpop.eup %3540 }
 0x35e   :  { %v3847_v16 = vpop.eup %3542  ;;  %v592_v17 = vpop.xlane.xlu1 %591  ;;  %v623_v32 = vsel %vm155_vm2, %v3845_v15, 0.0 }
 0x35f   :  { %v600_v18 = vsub.f32 %v568_v56, %v592_v17  ;;  %624 = vadd.xlane.f32.xlu0 %v623_v32  ;;  %v626_v19 = vsel %vm155_vm2, %v3847_v16, 0.0  ;;  %v589_v29 = vpop.xlane.xlu0 %588 }
 0x360   :  { %627 = vadd.xlane.f32.xlu1 %v626_v19  ;;  %v599_v33 = vsub.f32 %v567_v55, %v589_v29  ;;  %v38_v19 = vld [vmem:[#allocation2 + $0x10] sm:$0xf] }
 0x361   :  { %v615_v20 = vmul.f32 1.442695, %v600_v18 }
 0x362   :  { %v613_v34 = vmul.f32 1.442695, %v599_v33  ;;  %v763_v38 = vpop.permute.xlu1 %762 }
 0x363   :  { %3546 = vpow2.f32 %v615_v20  ;;  %v811_v35 = vpop.permute.xlu0 %810  ;;  %v768_v51 = vsel %vm670_vm3, %v763_v38, 0 }
 0x364   :  { %3548 = vpow2.f32 %v609_v30  ;;  %v816_v52 = vsel %vm670_vm3, %v811_v35, 0 }
 0x365   :  { %v3853_v21 = vpop.eup %3544  ;;  %3550 = vpow2.f32 %v613_v34 }
 0x366   :  { %v632_v22 = vsel %vm155_vm2, %v3853_v21, 0.0 }
 0x367   :  { %633 = vadd.xlane.f32.xlu1 %v632_v22  ;;  %v39_v22 = vld [vmem:[#allocation2 + $0x14] sm:$0xf] }
 0x36d   :  { %v3857_v25 = vpop.eup %3546 }
 0x36e   :  { %v638_v26 = vsel %vm155_vm2, %v3857_v25, 0.0  ;;  %v3866_v40 = vpop.eup %3548 }
 0x36f   :  { %639 = vadd.xlane.f32.xlu1 %v638_v26  ;;  %v3870_v43 = vpop.eup %3550 }
 0x375   :  { %906 = vrot.lane.b32.xlu0 %v3739_v31, %s3647_s22  ;;  %v629_v31 = vsel %vm155_vm2, %v3866_v40, 0.0 }
 0x380   :  { %954 = vrot.lane.b32.xlu1 %v3749_v36, %s3647_s22  ;;  %v635_v36 = vsel %vm155_vm2, %v3870_v43, 0.0 }
 0x393   :  { %v619_v41 = vpop.xlane.xlu0 %618  ;;  %v622_v42 = vpop.xlane.xlu1 %621 }
 0x394   :  { %3552 = vrcp.f32 %v619_v41  ;;  %630 = vadd.xlane.f32.xlu0 %v629_v31 }
 0x395   :  { %3554 = vrcp.f32 %v622_v42  ;;  %v41_v42 = vld [vmem:[#allocation2 + $0x1c] sm:$0xf] }
 0x397   :  { %v859_v53 = vpop.permute.xlu1 %858 }
 0x398   :  { %636 = vadd.xlane.f32.xlu0 %v635_v36  ;;  %v864_v2 = vsel %vm670_vm3, %v859_v53, 0 }
 0x39e   :  { %v3553_v39 = vpop.eup %3552 }
 0x39f   :  { %v3555_v44 = vpop.eup %3554  ;;  %v649_v45 = vmul.f32 %v3553_v39, %v3537_v3 }
 0x3a0   :  { %v650_v46 = vmul.f32 %v3555_v44, %v3539_v4 }
 0x3a1   :  { %v657_v47 = vpack.c.bf16 %v649_v45, %v649_v45 }
 0x3a2   :  { %v658_v50 = vpack.c.bf16 %v650_v46, %v650_v46  ;;  %v1199_v46 = vsel %vm670_vm3, %v41_v42, 0 }
 0x3a3   :  { %3229 = vmatmul.mubr.msk.bf16.vlgmr.msra.gmra.mrb[16].mxu1 %vm155_vm2, %v657_v47 }
 0x3a4   :  { %3235 = vmatmul.mubr.msk.bf16.vlgmr.msra.gmra.mrb[20].mxu0 %vm155_vm2, %v658_v50  ;;  %3239 = vmatpush3.bf16.msra.mxu1 %v768_v51 }
 0x3a5   :  { %3245 = vmatpush3.bf16.msra.mxu0 %v816_v52  ;;  %3240 = vmatprep.mubr.msk.bf16.mxu1 %vm3650_vm0, %v3649_v0 }
 0x3a6   :  { %3246 = vmatprep.mubr.msk.bf16.mxu0 %vm3650_vm0, %v3649_v0  ;;  %3250 = vmatprep.subr.bf16.mxu1 %v3649_v0 }
 0x3a7   :  { %3256 = vmatprep.subr.bf16.mxu0 %v3649_v0 }
 0x3ae   :  { %1002 = vrot.lane.b32.xlu0 %v3752_v37, %s3647_s22 }
 0x3ec   :  { %v625_v54 = vpop.xlane.xlu0 %624 }
 0x3ed   :  { %3556 = vrcp.f32 %v625_v54  ;;  %v628_v55 = vpop.xlane.xlu1 %627 }
 0x3ee   :  { %3558 = vrcp.f32 %v628_v55 }
 0x3f0   :  { %v907_v62 = vpop.permute.xlu0 %906 }
 0x3f1   :  { %v912_v37 = vsel %vm670_vm3, %v907_v62, 0 }
 0x3f4   :  { %v634_v56 = vpop.xlane.xlu1 %633 }
 0x3f5   :  { %3560 = vrcp.f32 %v634_v56 }
 0x3f7   :  { %v3557_v57 = vpop.eup %3556 }
 0x3f8   :  { %v3559_v58 = vpop.eup %3558  ;;  %v651_v59 = vmul.f32 %v3557_v57, %v3845_v15 }
 0x3f9   :  { %v652_v60 = vmul.f32 %v3559_v58, %v3847_v16 }
 0x3fa   :  { %v659_v63 = vpack.c.bf16 %v651_v59, %v651_v59 }
 0x3fb   :  { %v660_v1 = vpack.c.bf16 %v652_v60, %v652_v60 }
 0x3fc   :  { %3241 = vmatmul.mubr.msk.bf16.vlgmr.msra.gmra.mrb[20].mxu1 %vm155_vm2, %v659_v63  ;;  %v640_v9 = vpop.xlane.xlu1 %639 }
 0x3fd   :  { %3247 = vmatmul.mubr.msk.bf16.vlgmr.msra.gmra.mrb[24].mxu0 %vm155_vm2, %v660_v1  ;;  %3251 = vmatpush3.bf16.msra.mxu1 %v864_v2  ;;  %3562 = vrcp.f32 %v640_v9 }
 0x3fe   :  { %3257 = vmatpush3.bf16.msra.mxu0 %v912_v37  ;;  %3258 = vmatprep.mubr.msk.bf16.mxu0 %vm3650_vm0, %v3649_v0 }
 0x3ff   :  { %3268 = vmatprep.subr.bf16.mxu0 %v3649_v0  ;;  %3252 = vmatprep.mubr.msk.bf16.mxu1 %vm3650_vm0, %v3649_v0  ;;  %v3561_v3 = vpop.eup %3560 }
 0x400   :  { %3262 = vmatprep.subr.bf16.mxu1 %v3649_v0  ;;  %v654_v4 = vmul.f32 %v3561_v3, %v3853_v21  ;;  %v955_v15 = vpop.permute.xlu1 %954  ;;  %v1058_v21 = vsel %vm670_vm3, %v38_v19, 0 }
 0x401   :  { %v960_v32 = vsel %vm670_vm3, %v955_v15, 0 }
 0x402   :  { %v662_v8 = vpack.c.bf16 %v654_v4, %v654_v4 }
 0x405   :  { %3259 = vmatmul.mubr.msk.bf16.vlgmr.msra.gmra.mrb[28].mxu0 %vm155_vm2, %v662_v8 }
 0x406   :  { %3270 = vmatprep.mubr.msk.bf16.mxu0 %vm3650_vm0, %v3649_v0 }
 0x407   :  { %v3563_v24 = vpop.eup %3562 }
 0x408   :  { %v656_v61 = vmul.f32 %v3563_v24, %v3857_v25  ;;  %v1105_v25 = vsel %vm670_vm3, %v39_v22, 0 }
 0x40a   :  { %v664_v13 = vpack.c.bf16 %v656_v61, %v656_v61 }
 0x421   :  { %v631_v23 = vpop.xlane.xlu0 %630 }
 0x422   :  { %3564 = vrcp.f32 %v631_v23 }
 0x425   :  { %v637_v10 = vpop.xlane.xlu0 %636 }
 0x426   :  { %3566 = vrcp.f32 %v637_v10 }
 0x429   :  { %v1003_v5 = vpop.permute.xlu0 %1002 }
 0x42a   :  { %v1008_v11 = vsel %vm670_vm3, %v1003_v5, 0  ;;  %v3008_v5 = vld [vmem:[%s4272_s2 + $0x9] ss:$0 sm:$0xff] }
 0x42b   :  { %3269 = vmatpush3.bf16.msra.mxu0 %v1008_v11 }
 0x42c   :  { %v3565_v12 = vpop.eup %3564  ;;  %3280 = vmatprep.subr.bf16.mxu0 %v3649_v0 }
 0x42d   :  { %v653_v14 = vmul.f32 %v3565_v12, %v3866_v40  ;;  %v40_v40 = vld [vmem:[#allocation2 + $0x18] sm:$0xf] }
 0x42e   :  { %3271 = vmatmul.mubr.msk.bf16.vlgmr.msra.gmra.mrb[32].mxu0 %vm155_vm2, %v664_v13  ;;  %v1152_v41 = vsel %vm670_vm3, %v40_v40, 0 }
 0x42f   :  { %v661_v16 = vpack.c.bf16 %v653_v14, %v653_v14  ;;  %3282 = vmatprep.mubr.msk.bf16.mxu0 %vm3650_vm0, %v3649_v0  ;;  %3281 = vmatpush3.bf16.msra.mxu0 %v1105_v25 }
 0x430   :  { %v3567_v17 = vpop.eup %3566  ;;  %3292 = vmatprep.subr.bf16.mxu0 %v3649_v0 }
 0x431   :  { %3253 = vmatmul.mubr.msk.bf16.vlgmr.msra.gmra.mrb[24].mxu1 %vm155_vm2, %v661_v16  ;;  %v655_v18 = vmul.f32 %v3567_v17, %v3870_v43 }
 0x432   :  { %3263 = vmatpush3.bf16.msra.mxu1 %v960_v32  ;;  %3264 = vmatprep.mubr.msk.bf16.mxu1 %vm3650_vm0, %v3649_v0 }
 0x433   :  { %3274 = vmatprep.subr.bf16.mxu1 %v3649_v0  ;;  %v663_v20 = vpack.c.bf16 %v655_v18, %v655_v18 }
 0x439   :  { %3265 = vmatmul.mubr.msk.bf16.vlgmr.msra.gmra.mrb[28].mxu1 %vm155_vm2, %v663_v20 }
 0x43a   :  { %3275 = vmatpush3.bf16.msra.mxu1 %v1058_v21  ;;  %3276 = vmatprep.mubr.msk.bf16.mxu1 %vm3650_vm0, %v3649_v0 }
 0x43b   :  { %3286 = vmatprep.subr.bf16.mxu1 %v3649_v0 }
 0x476   :  { %v708_v26 = vpop.f32.mrb[16].mxu1 }
 0x477   :  { %v756_v27 = vpop.f32.mrb[20].mxu0  ;;  %v3230_v28 = vpop.f32.mrb[17].mxu1 }
 0x478   :  { %v1050_v29 = vpack.c.bf16 %v756_v27, %v708_v26  ;;  %v3236_v30 = vpop.f32.mrb[21].mxu0  ;;  %v711_v33 = vpop.f32.mrb[18].mxu1 }
 0x479   :  { %v759_v34 = vpop.f32.mrb[22].mxu0  ;;  %v3231_v35 = vpop.f32.mrb[19].mxu1 }
 0x47a   :  { %v3237_v38 = vpop.f32.mrb[23].mxu0  ;;  %3277 = vmatmul.mubr.msk.bf16.vlgmr.msra.gmra.mrb[32].mxu1 %vm155_vm2, %v1050_v29 }
 0x47b   :  { %3288 = vmatprep.mubr.msk.bf16.mxu1 %vm3650_vm0, %v3649_v0  ;;  %3287 = vmatpush3.bf16.msra.mxu1 %v1152_v41 }
 0x47c   :  { %3298 = vmatprep.subr.bf16.mxu1 %v3649_v0 }
 0x4cf   :  { %v804_v31 = vpop.f32.mrb[20].mxu1 }
 0x4d0   :  { %v852_v43 = vpop.f32.mrb[24].mxu0  ;;  %v3242_v36 = vpop.f32.mrb[21].mxu1 }
 0x4d1   :  { %v1051_v39 = vpack.c.bf16 %v852_v43, %v804_v31  ;;  %v3248_v44 = vpop.f32.mrb[25].mxu0  ;;  %v807_v45 = vpop.f32.mrb[22].mxu1 }
 0x4d2   :  { %v855_v47 = vpop.f32.mrb[26].mxu0  ;;  %v3243_v50 = vpop.f32.mrb[23].mxu1 }
 0x4d3   :  { %v3249_v51 = vpop.f32.mrb[27].mxu0  ;;  %3283 = vmatmul.mubr.msk.bf16.vlgmr.msra.gmra.mrb[36].mxu0 %vm155_vm2, %v1051_v39  ;;  %v3520_v47 = vld [vmem:[#allocation2 + $0x20] sm:$0xff]   ;;  %v3522_v50 = vld [vmem:[#allocation2 + $0x30] sm:$0xff]  }
 0x4d4   :  { %3293 = vmatpush3.bf16.msra.mxu0 %v1199_v46  ;;  %3294 = vmatprep.mubr.msk.bf16.mxu0 %vm3650_vm0, %v3649_v0  ;;  %v3523_v51 = vld [vmem:[#allocation2 + $0x38] sm:$0xff]  }
 0x4d5   :  { %3306 = vmatprep.subr.bf16.mxu0 %v3649_v0 }
 0x4d8   :  { %v948_v52 = vpop.f32.mrb[28].mxu0 }
 0x4d9   :  { %v3260_v53 = vpop.f32.mrb[29].mxu0 }
 0x4da   :  { %v951_v54 = vpop.f32.mrb[30].mxu0 }
 0x4db   :  { %v3261_v55 = vpop.f32.mrb[31].mxu0 }
 0x501   :  { %v1044_v56 = vpop.f32.mrb[32].mxu0 }
 0x502   :  { %v3272_v57 = vpop.f32.mrb[33].mxu0 }
 0x503   :  { %v1047_v58 = vpop.f32.mrb[34].mxu0 }
 0x504   :  { %v900_v59 = vpop.f32.mrb[24].mxu1  ;;  %v3273_v60 = vpop.f32.mrb[35].mxu0 }
 0x505   :  { %v1052_v62 = vpack.c.bf16 %v948_v52, %v900_v59  ;;  %v3254_v63 = vpop.f32.mrb[25].mxu1  ;;  %v3009_v59 = vld [vmem:[%s4272_s2 + $0xc] ss:$0 sm:$0xff] }
 0x506   :  { %v903_v1 = vpop.f32.mrb[26].mxu1 }
 0x507   :  { %v3255_v2 = vpop.f32.mrb[27].mxu1  ;;  %3289 = vmatmul.mubr.msk.bf16.vlgmr.msra.gmra.mrb[36].mxu1 %vm155_vm2, %v1052_v62 }
 0x508   :  { %3302 = vmatprep.mubr.msk.bf16.mxu1 %vm3650_vm0, %v3649_v0  ;;  %3299 = vmatpush3.bf16.msra.mxu1 %v3520_v47  ;;  %v3010_v2 = vld [vmem:[%s4272_s2 + $0xd] ss:$0 sm:$0xff] }
 0x509   :  { %3300 = vmatprep.subr.bf16.mxu1 %v3649_v0 }
 0x50c   :  { %v996_v37 = vpop.f32.mrb[28].mxu1 }
 0x50d   :  { %v1053_v3 = vpack.c.bf16 %v1044_v56, %v996_v37  ;;  %v3266_v4 = vpop.f32.mrb[29].mxu1 }
 0x50e   :  { %v999_v8 = vpop.f32.mrb[30].mxu1 }
 0x50f   :  { %v3267_v9 = vpop.f32.mrb[31].mxu1  ;;  %3295 = vmatmul.mubr.msk.bf16.vlgmr.msra.gmra.mrb[40].mxu0 %vm155_vm2, %v1053_v3 }
 0x510   :  { %3314 = vmatprep.mubr.msk.bf16.mxu0 %vm3650_vm0, %v3649_v0  ;;  %3307 = vmatpush3.bf16.msra.mxu0 %v3522_v50  ;;  %v3524_v9 = vld [vmem:[#allocation2 + $0x40] sm:$0xff]   ;;  %v3021_v50 = vld [vmem:[%s4272_s2 + $0xe] ss:$0 sm:$0xff] }
 0x511   :  { %3308 = vmatprep.subr.bf16.mxu0 %v3649_v0 }
 0x514   :  { %3309 = vmatpush3.bf16.msra.mxu0 %v3523_v51 }
 0x515   :  { %3310 = vmatprep.subr.bf16.mxu0 %v3649_v0 }
 0x518   :  { %3311 = vmatpush3.bf16.msra.mxu0 %v3524_v9 }
 0x519   :  { %3312 = vmatprep.subr.bf16.mxu0 %v3649_v0 }
 0x54d   :  { %v1094_v23 = vpop.f32.mrb[32].mxu1 }
 0x54e   :  { %v3278_v24 = vpop.f32.mrb[33].mxu1  ;;  %v1246_v11 = vadd.f32 %v3008_v5, %v1094_v23  ;;  %v3525_v23 = vld [vmem:[#allocation2 + $0x48] sm:$0xff]  }
 0x54f   :  { %v1097_v10 = vpop.f32.mrb[34].mxu1  ;;  %3313 = vmatpush3.bf16.msra.mxu0 %v3525_v23  ;;  %v3011_v24 = vld [vmem:[%s4272_s2 + $0xa] ss:$0 sm:$0xff] }
 0x550   :  { %v3279_v61 = vpop.f32.mrb[35].mxu1  ;;  %v1247_v13 = vadd.f32 %v3008_v5, %v1097_v10  ;;  %3332 = vmatprep.subr.bf16.mxu0 %v3649_v0 }
 0x5a6   :  { %v1141_v12 = vpop.f32.mrb[36].mxu0 }
 0x5a7   :  { %v1248_v14 = vadd.f32 %v1246_v11, %v1141_v12  ;;  %v3284_v15 = vpop.f32.mrb[37].mxu0 }
 0x5a8   :  { %v1144_v16 = vpop.f32.mrb[38].mxu0 }
 0x5a9   :  { %v1249_v17 = vadd.f32 %v1247_v13, %v1144_v16  ;;  %v3285_v32 = vpop.f32.mrb[39].mxu0 }
 0x5da   :  { %v1188_v18 = vpop.f32.mrb[36].mxu1 }
 0x5db   :  { %v1250_v19 = vadd.f32 %v1248_v14, %v1188_v18  ;;  %v3290_v20 = vpop.f32.mrb[37].mxu1 }
 0x5dc   :  { %v1191_v21 = vpop.f32.mrb[38].mxu1 }
 0x5dd   :  { %v1251_v22 = vadd.f32 %v1249_v17, %v1191_v21  ;;  %v3291_v25 = vpop.f32.mrb[39].mxu1  ;;  %v3015_v17 = vld [vmem:[%s4272_s2 + $0xb] ss:$0 sm:$0xff] }
 0x5e2   :  { %v1235_v26 = vpop.f32.mrb[40].mxu0 }
 0x5e3   :  { %v1252_v27 = vadd.f32 %v1250_v19, %v1235_v26  ;;  %v3296_v28 = vpop.f32.mrb[41].mxu0 }
 0x5e4   :  { %v1238_v29 = vpop.f32.mrb[42].mxu0 }
 0x5e5   :  { %v1253_v30 = vadd.f32 %v1251_v22, %v1238_v29  ;;  %v3297_v33 = vpop.f32.mrb[43].mxu0  ;;  %v1254_v34 = vadd.f32 %v1252_v27, %v3711_v6 }
 0x5e7   :  { %v1256_v35 = vsel %vm79_vm1, %v1254_v34, 0.0  ;;  %v1255_v38 = vadd.f32 %v1253_v30, %v3714_v7  ;;  %v3521_v7 = vld [vmem:[#allocation2 + $0x28] sm:$0xff]  }
 0x5e8   :  { %1257 = vadd.xlane.f32.xlu1 %v1256_v35  ;;  %3301 = vmatpush3.bf16.msra.mxu1 %v3521_v7 }
 0x5e9   :  { %v1259_v40 = vsel %vm79_vm1, %v1255_v38, 0.0  ;;  %3318 = vmatprep.subr.bf16.mxu1 %v3649_v0 }
 0x5ea   :  { %1260 = vadd.xlane.f32.xlu0 %v1259_v40 }
 0x675   :  { %v1258_v41 = vpop.xlane.xlu1 %1257 }
 0x676   :  { %v1263_v42 = vmul.f32 0.03125, %v1258_v41 }
 0x677   :  { %v1261_v31 = vpop.xlane.xlu0 %1260 }
 0x678   :  { %v1265_v43 = vsub.f32 %v1254_v34, %v1263_v42  ;;  %v1264_v36 = vmul.f32 0.03125, %v1261_v31 }
 0x67a   :  { %v1266_v39 = vsub.f32 %v1255_v38, %v1264_v36  ;;  %v1267_v44 = vmul.f32 %v1265_v43, %v1265_v43  ;;  %v3527_v36 = vld [vmem:[#allocation2 + $0x58] sm:$0xff]  }
 0x67c   :  { %v1269_v45 = vsel %vm79_vm1, %v1267_v44, 0.0  ;;  %v1268_v46 = vmul.f32 %v1266_v39, %v1266_v39 }
 0x67d   :  { %1270 = vadd.xlane.f32.xlu0 %v1269_v45 }
 0x67e   :  { %v1272_v6 = vsel %vm79_vm1, %v1268_v46, 0.0 }
 0x67f   :  { %1273 = vadd.xlane.f32.xlu1 %v1272_v6 }
 0x70a   :  { %v1271_v52 = vpop.xlane.xlu0 %1270 }
 0x70b   :  { %v1275_v53 = vmul.f32 0.03125, %v1271_v52 }
 0x70c   :  { %v1274_v54 = vpop.xlane.xlu1 %1273 }
 0x70d   :  { %v1277_v55 = vadd.f32 1e-06, %v1275_v53  ;;  %v1276_v56 = vmul.f32 0.03125, %v1274_v54 }
 0x70f   :  { %3568 = vrsqrt.f32 %v1277_v55  ;;  %v1278_v57 = vadd.f32 1e-06, %v1276_v56  ;;  %v3022_v55 = vld [vmem:[%s4272_s2 + $0xf] ss:$0 sm:$0xff] }
 0x711   :  { %3570 = vrsqrt.f32 %v1278_v57 }
 0x719   :  { %v3569_v58 = vpop.eup %3568 }
 0x71a   :  { %v1281_v60 = vmul.f32 %v3569_v58, %v1265_v43  ;;  %v3526_v43 = vld [vmem:[#allocation2 + $0x50] sm:$0xff]  }
 0x71b   :  { %v3571_v62 = vpop.eup %3570 }
 0x71c   :  { %v1287_v63 = vmul.f32 %v3009_v59, %v1281_v60  ;;  %v1282_v1 = vmul.f32 %v3571_v62, %v1266_v39  ;;  %v3023_v60 = vld [vmem:[%s4272_s2 + $0x10] ss:$0 sm:$0xff] }
 0x71e   :  { %v1288_v37 = vmul.f32 %v3009_v59, %v1282_v1  ;;  %v1293_v3 = vadd.f32 %v3010_v2, %v1287_v63 }
 0x720   :  { %v1294_v4 = vadd.f32 %v3010_v2, %v1288_v37 }
 0x722   :  { %v1295_v8 = vpack.c.bf16 %v1294_v4, %v1293_v3 }
 0x724   :  { %3303 = vmatmul.mubr.msk.bf16.vlgmr.msra.gmra.mrb[40].mxu1 %vm79_vm1, %v1295_v8 }
 0x725   :  { %3322 = vmatprep.mubr.msk.bf16.mxu1 %vm3650_vm0, %v3649_v0  ;;  %3319 = vmatpush3.bf16.msra.mxu1 %v3526_v43 }
 0x726   :  { %3320 = vmatprep.subr.bf16.mxu1 %v3649_v0 }
 0x729   :  { %3321 = vmatpush3.bf16.msra.mxu1 %v3527_v36 }
 0x72a   :  { %3326 = vmatprep.subr.bf16.mxu1 %v3649_v0 }
 0x7f7   :  { %v1349_v10 = vpop.f32.mrb[40].mxu1 }
 0x7f8   :  { %v1350_v61 = vadd.f32 %v3011_v24, %v1349_v10  ;;  %v3304_v5 = vpop.f32.mrb[41].mxu1 }
 0x7f9   :  { %v1352_v11 = vpop.f32.mrb[42].mxu1 }
 0x7fa   :  { %v1353_v12 = vadd.f32 %v3011_v24, %v1352_v11  ;;  %v3305_v13 = vpop.f32.mrb[43].mxu1  ;;  %v1356_v14 = vmax.f32 %v1350_v61, 0.0 }
 0x7fc   :  { %v1357_v15 = vmax.f32 %v1353_v12, 0.0 }
 0x7fe   :  { %v1358_v16 = vpack.c.bf16 %v1357_v15, %v1356_v14 }
 0x800   :  { %3315 = vmatmul.mubr.msk.bf16.vlgmr.msra.gmra.mrb[44].mxu0 %vm1387_vm4, %v1358_v16 }
 0x801   :  { %3334 = vmatprep.mubr.msk.bf16.mxu0 %vm3650_vm0, %v3649_v0 }
 0x8d3   :  { %v1425_v32 = vpop.f32.mrb[44].mxu0 }
 0x8d4   :  { %v1426_v18 = vadd.f32 %v3015_v17, %v1425_v32  ;;  %v3316_v19 = vpop.f32.mrb[45].mxu0 }
 0x8d5   :  { %v1428_v20 = vpop.f32.mrb[46].mxu0 }
 0x8d6   :  { %v1429_v21 = vadd.f32 %v3015_v17, %v1428_v20  ;;  %v3317_v22 = vpop.f32.mrb[47].mxu0  ;;  %v1432_v25 = vadd.f32 %v1426_v18, %v1293_v3 }
 0x8d8   :  { %v1434_v26 = vsel %vm79_vm1, %v1432_v25, 0.0  ;;  %v1433_v27 = vadd.f32 %v1429_v21, %v1294_v4 }
 0x8d9   :  { %1435 = vadd.xlane.f32.xlu0 %v1434_v26 }
 0x8da   :  { %v1437_v28 = vsel %vm79_vm1, %v1433_v27, 0.0 }
 0x8db   :  { %1438 = vadd.xlane.f32.xlu1 %v1437_v28 }
 0x966   :  { %v1436_v29 = vpop.xlane.xlu0 %1435 }
 0x967   :  { %v1440_v30 = vmul.f32 0.03125, %v1436_v29 }
 0x968   :  { %v1439_v33 = vpop.xlane.xlu1 %1438 }
 0x969   :  { %v1442_v34 = vsub.f32 %v1432_v25, %v1440_v30  ;;  %v1441_v35 = vmul.f32 0.03125, %v1439_v33 }
 0x96b   :  { %v1443_v38 = vsub.f32 %v1433_v27, %v1441_v35  ;;  %v1444_v40 = vmul.f32 %v1442_v34, %v1442_v34 }
 0x96d   :  { %v1446_v41 = vsel %vm79_vm1, %v1444_v40, 0.0  ;;  %v1445_v42 = vmul.f32 %v1443_v38, %v1443_v38 }
 0x96e   :  { %1447 = vadd.xlane.f32.xlu0 %v1446_v41 }
 0x96f   :  { %v1449_v31 = vsel %vm79_vm1, %v1445_v42, 0.0 }
 0x970   :  { %1450 = vadd.xlane.f32.xlu1 %v1449_v31 }
 0x9fb   :  { %v1448_v39 = vpop.xlane.xlu0 %1447 }
 0x9fc   :  { %v1452_v44 = vmul.f32 0.03125, %v1448_v39 }
 0x9fd   :  { %v1451_v45 = vpop.xlane.xlu1 %1450 }
 0x9fe   :  { %v1454_v46 = vadd.f32 1e-06, %v1452_v44  ;;  %v1453_v6 = vmul.f32 0.03125, %v1451_v45 }
 0xa00   :  { %3572 = vrsqrt.f32 %v1454_v46  ;;  %v1455_v47 = vadd.f32 1e-06, %v1453_v6 }
 0xa02   :  { %3574 = vrsqrt.f32 %v1455_v47 }
 0xa0a   :  { %v3573_v7 = vpop.eup %3572 }
 0xa0b   :  { %v1458_v51 = vmul.f32 %v3573_v7, %v1442_v34 }
 0xa0c   :  { %v3575_v52 = vpop.eup %3574 }
 0xa0d   :  { %v1464_v53 = vmul.f32 %v3021_v50, %v1458_v51  ;;  %v1459_v54 = vmul.f32 %v3575_v52, %v1443_v38 }
 0xa0f   :  { %v1465_v56 = vmul.f32 %v3021_v50, %v1459_v54  ;;  %v3983_v57 = vadd.f32 %v3022_v55, %v1464_v53 }
 0xa11   :  { %v3985_v58 = vadd.f32 %v3022_v55, %v1465_v56 }
 0xa13   :  { %v1500_v59 = vpack.c.bf16 %v3985_v58, %v3983_v57 }
 0xa15   :  { %3323 = vmatmul.mubr.msk.bf16.vlgmr.msra.gmra.mrb[44].mxu1 %vm79_vm1, %v1500_v59 }
 0xa16   :  { %3328 = vmatprep.mubr.msk.bf16.mxu1 %vm3650_vm0, %v3649_v0 }
 0xae8   :  { %v1554_v62 = vpop.f32.mrb[44].mxu1 }
 0xae9   :  { %v3324_v63 = vpop.f32.mrb[45].mxu1  ;;  %v1555_v2 = vadd.f32 %v3023_v60, %v1554_v62 }
 0xaea   :  { %v1557_v1 = vpop.f32.mrb[46].mxu1 }
 0xaeb   :  { %v1558_v37 = vadd.f32 %v3023_v60, %v1557_v1  ;;  %v3325_v3 = vpop.f32.mrb[47].mxu1  ;;  %v1581_v8 = vpack.c.bf16 %v1555_v2, %v1555_v2 }
 0xaed   :  { %v3506_v4 = vpack.i.bf16 %v1558_v37, %v1555_v2  ;;  %v3999_v9 = vpack.c.bf16 %v1558_v37, %v1558_v37 }
 0xaef   :  { %3507 = vrot.lane.b32.xlu1 %v3506_v4, %s3654_s9  ;;  %3502 = vrot.lane.b32.xlu0 %v3506_v4, %s3652_s7 }
 0xaf3   :  { %3512 = vrot.lane.b32.xlu1 %v3506_v4, %s3651_s6  ;;  %1590 = vrot.lane.b32.xlu0 %v1581_v8, %s3653_s8 }
 0xaf7   :  { %1639 = vrot.lane.b32.xlu1 %v3999_v9, %s3653_s8 }
 0xb61   :  { %v3508_v23 = vpop.permute.xlu1 %3507  ;;  %v3503_v24 = vpop.permute.xlu0 %3502 }
 0xb62   :  { %v3505_v10 = vunpack.i.h.bf16 %v3503_v24  ;;  %v3504_v61 = vunpack.i.l.bf16 %v3503_v24  ;;  %v3510_v5 = vunpack.i.h.bf16 %v3508_v23  ;;  %v3509_v11 = vunpack.i.l.bf16 %v3508_v23 }
 0xb64   :  { %v4003_v12 = vpack.c.bf16 %v3505_v10, %v3505_v10  ;;  %v4005_v13 = vpack.c.bf16 %v3504_v61, %v3504_v61  ;;  %v4012_v17 = vpack.c.bf16 %v3510_v5, %v3510_v5  ;;  %v4014_v32 = vpack.c.bf16 %v3509_v11, %v3509_v11 }
 0xb65   :  { %v3513_v14 = vpop.permute.xlu1 %3512  ;;  %v1591_v15 = vpop.permute.xlu0 %1590 }
 0xb66   :  { %v1596_v16 = vsel %vm155_vm2, %v1591_v15, 0  ;;  %1688 = vrot.lane.b32.xlu0 %v4005_v13, %s3653_s8  ;;  %1737 = vrot.lane.b32.xlu1 %v4003_v12, %s3653_s8  ;;  %v3514_v18 = vunpack.i.l.bf16 %v3513_v14  ;;  %v3515_v19 = vunpack.i.h.bf16 %v3513_v14 }
 0xb67   :  { %3327 = vmatpush3.bf16.xpose.msra.mxu1 %v1596_v16 }
 0xb68   :  { %3338 = vmatprep.subr.bf16.mxu1 %v3649_v0  ;;  %v4022_v22 = vpack.c.bf16 %v3514_v18, %v3514_v18  ;;  %v4025_v25 = vpack.c.bf16 %v3515_v19, %v3515_v19 }
 0xb69   :  { %v1640_v20 = vpop.permute.xlu1 %1639 }
 0xb6a   :  { %v1645_v21 = vsel %vm155_vm2, %v1640_v20, 0  ;;  %1786 = vrot.lane.b32.xlu0 %v4014_v32, %s3653_s8  ;;  %1835 = vrot.lane.b32.xlu1 %v4012_v17, %s3653_s8 }
 0xb6b   :  { %3333 = vmatpush3.bf16.xpose.msra.mxu0 %v1645_v21 }
 0xb6c   :  { %3344 = vmatprep.subr.bf16.mxu0 %v3649_v0 }
 0xb6e   :  { %3329 = vmatmul.mubr.msk.bf16.vlgmr.msra.gmra.mrb[48].mxu1 %vm155_vm2, %v1581_v8  ;;  %1884 = vrot.lane.b32.xlu0 %v4022_v22, %s3653_s8 }
 0xb6f   :  { %1933 = vrot.lane.b32.xlu1 %v4025_v25, %s3653_s8  ;;  %3340 = vmatprep.mubr.msk.bf16.mxu1 %vm3650_vm0, %v3649_v0 }
 0xb72   :  { %3335 = vmatmul.mubr.msk.bf16.vlgmr.msra.gmra.mrb[48].mxu0 %vm155_vm2, %v3999_v9 }
 0xb73   :  { %2093 = vrot.lane.b32.xlu1 %v1581_v8, %s3647_s22  ;;  %3346 = vmatprep.mubr.msk.bf16.mxu0 %vm3650_vm0, %v3649_v0 }
 0xbd8   :  { %v1689_v26 = vpop.permute.xlu0 %1688  ;;  %v1738_v27 = vpop.permute.xlu1 %1737 }
 0xbd9   :  { %v1694_v28 = vsel %vm155_vm2, %v1689_v26, 0  ;;  %v1743_v29 = vsel %vm155_vm2, %v1738_v27, 0 }
 0xbda   :  { %3339 = vmatpush3.bf16.xpose.msra.mxu1 %v1694_v28  ;;  %3345 = vmatpush3.bf16.xpose.msra.mxu0 %v1743_v29 }
 0xbdb   :  { %3350 = vmatprep.subr.bf16.mxu1 %v3649_v0  ;;  %3356 = vmatprep.subr.bf16.mxu0 %v3649_v0 }
 0xbdc   :  { %v1787_v30 = vpop.permute.xlu0 %1786  ;;  %v1836_v33 = vpop.permute.xlu1 %1835 }
 0xbdd   :  { %v1792_v34 = vsel %vm155_vm2, %v1787_v30, 0  ;;  %v1841_v35 = vsel %vm155_vm2, %v1836_v33, 0 }
 0xbe0   :  { %v1885_v38 = vpop.permute.xlu0 %1884 }
 0xbe1   :  { %3341 = vmatmul.mubr.msk.bf16.vlgmr.msra.gmra.mrb[52].mxu1 %vm155_vm2, %v4005_v13  ;;  %3347 = vmatmul.mubr.msk.bf16.vlgmr.msra.gmra.mrb[52].mxu0 %vm155_vm2, %v4003_v12  ;;  %v1934_v40 = vpop.permute.xlu1 %1933  ;;  %v1890_v41 = vsel %vm155_vm2, %v1885_v38, 0 }
 0xbe2   :  { %3351 = vmatpush3.bf16.xpose.msra.mxu1 %v1792_v34  ;;  %3357 = vmatpush3.bf16.xpose.msra.mxu0 %v1841_v35  ;;  %v1939_v42 = vsel %vm155_vm2, %v1934_v40, 0 }
 0xbe3   :  { %3352 = vmatprep.mubr.msk.bf16.mxu1 %vm3650_vm0, %v3649_v0  ;;  %3358 = vmatprep.mubr.msk.bf16.mxu0 %vm3650_vm0, %v3649_v0 }
 0xbe4   :  { %3362 = vmatprep.subr.bf16.mxu1 %v3649_v0  ;;  %3368 = vmatprep.subr.bf16.mxu0 %v3649_v0 }
 0xbe5   :  { %v2094_v31 = vpop.permute.xlu1 %2093 }
 0xbe6   :  { %v2099_v43 = vsel %vm670_vm3, %v2094_v31, 0 }
 0xbe9   :  { %3353 = vmatmul.mubr.msk.bf16.vlgmr.msra.gmra.mrb[56].mxu1 %vm155_vm2, %v4014_v32  ;;  %3359 = vmatmul.mubr.msk.bf16.vlgmr.msra.gmra.mrb[56].mxu0 %vm155_vm2, %v4012_v17 }
 0xbea   :  { %3363 = vmatpush3.bf16.xpose.msra.mxu1 %v1890_v41  ;;  %3369 = vmatpush3.bf16.xpose.msra.mxu0 %v1939_v42 }
 0xbeb   :  { %3364 = vmatprep.mubr.msk.bf16.mxu1 %vm3650_vm0, %v3649_v0  ;;  %3370 = vmatprep.mubr.msk.bf16.mxu0 %vm3650_vm0, %v3649_v0 }
 0xbec   :  { %3374 = vmatprep.subr.bf16.mxu1 %v3649_v0  ;;  %3380 = vmatprep.subr.bf16.mxu0 %v3649_v0 }
 0xbf1   :  { %3365 = vmatmul.mubr.msk.bf16.vlgmr.msra.gmra.mrb[60].mxu1 %vm155_vm2, %v4022_v22  ;;  %3371 = vmatmul.mubr.msk.bf16.vlgmr.msra.gmra.mrb[60].mxu0 %vm155_vm2, %v4025_v25 }
 0xbf2   :  { %3375 = vmatpush3.bf16.msra.mxu1 %v2099_v43  ;;  %3382 = vmatprep.mubr.msk.bf16.mxu0 %vm3650_vm0, %v3649_v0 }
 0xbf3   :  { %3376 = vmatprep.mubr.msk.bf16.mxu1 %vm3650_vm0, %v3649_v0  ;;  %3386 = vmatprep.subr.bf16.mxu1 %v3649_v0 }
 0xc41   :  { %v1632_v36 = vpop.f32.mrb[48].mxu1 }
 0xc42   :  { %v1981_v39 = vmul.f32 0.35355338, %v1632_v36  ;;  %v3330_v44 = vpop.f32.mrb[49].mxu1 }
 0xc43   :  { %v1635_v45 = vpop.f32.mrb[50].mxu1 }
 0xc44   :  { %v3331_v46 = vpop.f32.mrb[51].mxu1  ;;  %v4078_v6 = vadd.f32 %v1981_v39, %v3786_v48 }
 0xc45   :  { %v1681_v47 = vpop.f32.mrb[48].mxu0 }
 0xc46   :  { %v1982_v7 = vmul.f32 0.35355338, %v1681_v47  ;;  %v3336_v50 = vpop.f32.mrb[49].mxu0  ;;  %v1997_v51 = vsel %vm155_vm2, %v4078_v6, -inf }
 0xc47   :  { %1998 = vmax.xlane.f32.xlu0 %v1997_v51  ;;  %v1684_v52 = vpop.f32.mrb[50].mxu0 }
 0xc48   :  { %v3337_v53 = vpop.f32.mrb[51].mxu0  ;;  %v1990_v54 = vadd.f32 %v1982_v7, %v3788_v49 }
 0xc4a   :  { %v2000_v55 = vsel %vm155_vm2, %v1990_v54, -inf }
 0xc4b   :  { %2001 = vmax.xlane.f32.xlu1 %v2000_v55 }
 0xcb4   :  { %v1730_v56 = vpop.f32.mrb[52].mxu1  ;;  %v1779_v59 = vpop.f32.mrb[52].mxu0 }
 0xcb5   :  { %v1983_v60 = vmul.f32 0.35355338, %v1730_v56  ;;  %v1984_v62 = vmul.f32 0.35355338, %v1779_v59  ;;  %v3342_v63 = vpop.f32.mrb[53].mxu1  ;;  %v3348_v1 = vpop.f32.mrb[53].mxu0 }
 0xcb6   :  { %v1733_v2 = vpop.f32.mrb[54].mxu1  ;;  %v1782_v37 = vpop.f32.mrb[54].mxu0 }
 0xcb7   :  { %v3343_v3 = vpop.f32.mrb[55].mxu1  ;;  %v3349_v4 = vpop.f32.mrb[55].mxu0  ;;  %v1991_v8 = vadd.f32 %v1983_v60, %v3786_v48  ;;  %v1992_v23 = vadd.f32 %v1984_v62, %v3788_v49 }
 0xcb9   :  { %v2003_v24 = vsel %vm155_vm2, %v1991_v8, -inf  ;;  %v2006_v5 = vsel %vm155_vm2, %v1992_v23, -inf }
 0xcba   :  { %2004 = vmax.xlane.f32.xlu0 %v2003_v24 }
 0xcbc   :  { %v1828_v10 = vpop.f32.mrb[56].mxu1  ;;  %v1877_v61 = vpop.f32.mrb[56].mxu0 }
 0xcbd   :  { %v1985_v11 = vmul.f32 0.35355338, %v1828_v10  ;;  %v1986_v14 = vmul.f32 0.35355338, %v1877_v61  ;;  %v3354_v15 = vpop.f32.mrb[57].mxu1  ;;  %v3360_v16 = vpop.f32.mrb[57].mxu0 }
 0xcbe   :  { %v1831_v18 = vpop.f32.mrb[58].mxu1  ;;  %2007 = vmax.xlane.f32.xlu0 %v2006_v5  ;;  %v1880_v19 = vpop.f32.mrb[58].mxu0 }
 0xcbf   :  { %v3355_v20 = vpop.f32.mrb[59].mxu1  ;;  %v3361_v21 = vpop.f32.mrb[59].mxu0  ;;  %v4089_v26 = vadd.f32 %v1985_v11, %v3786_v48  ;;  %v4092_v27 = vadd.f32 %v1986_v14, %v3788_v49 }
 0xcc1   :  { %v2009_v28 = vsel %vm155_vm2, %v4089_v26, -inf  ;;  %v2012_v29 = vsel %vm155_vm2, %v4092_v27, -inf }
 0xcc2   :  { %2010 = vmax.xlane.f32.xlu1 %v2009_v28  ;;  %2013 = vmax.xlane.f32.xlu0 %v2012_v29 }
 0xcc4   :  { %v1926_v30 = vpop.f32.mrb[60].mxu1  ;;  %v1975_v33 = vpop.f32.mrb[60].mxu0 }
 0xcc5   :  { %v1987_v34 = vmul.f32 0.35355338, %v1926_v30  ;;  %v1988_v35 = vmul.f32 0.35355338, %v1975_v33  ;;  %v3366_v38 = vpop.f32.mrb[61].mxu1  ;;  %v3372_v40 = vpop.f32.mrb[61].mxu0 }
 0xcc6   :  { %v1929_v41 = vpop.f32.mrb[62].mxu1  ;;  %v1978_v42 = vpop.f32.mrb[62].mxu0 }
 0xcc7   :  { %v3367_v31 = vpop.f32.mrb[63].mxu1  ;;  %v3373_v43 = vpop.f32.mrb[63].mxu0  ;;  %v1995_v36 = vadd.f32 %v1987_v34, %v3786_v48  ;;  %v1996_v39 = vadd.f32 %v1988_v35, %v3788_v49 }
 0xcc9   :  { %v2015_v44 = vsel %vm155_vm2, %v1995_v36, -inf  ;;  %v2018_v45 = vsel %vm155_vm2, %v1996_v39, -inf }
 0xcca   :  { %2016 = vmax.xlane.f32.xlu1 %v2015_v44  ;;  %2019 = vmax.xlane.f32.xlu0 %v2018_v45 }
 0xcd4   :  { %v1999_v48 = vpop.xlane.xlu0 %1998 }
 0xcd5   :  { %v2021_v49 = vsub.f32 %v4078_v6, %v1999_v48 }
 0xcd7   :  { %v2029_v50 = vmul.f32 1.442695, %v2021_v49 }
 0xcd8   :  { %v2002_v46 = vpop.xlane.xlu1 %2001 }
 0xcd9   :  { %v2022_v47 = vsub.f32 %v1990_v54, %v2002_v46 }
 0xcdb   :  { %2189 = vrot.lane.b32.xlu1 %v4005_v13, %s3647_s22  ;;  %v2031_v7 = vmul.f32 1.442695, %v2022_v47 }
 0xcdd   :  { %3576 = vpow2.f32 %v2031_v7 }
 0xcde   :  { %3578 = vpow2.f32 %v2029_v50 }
 0xcdf   :  { %2237 = vrot.lane.b32.xlu1 %v4003_v12, %s3647_s22 }
 0xce0   :  { %2141 = vrot.lane.b32.xlu0 %v3999_v9, %s3647_s22 }
 0xce7   :  { %v3577_v51 = vpop.eup %3576 }
 0xce8   :  { %v2048_v52 = vsel %vm155_vm2, %v3577_v51, 0.0  ;;  %v4110_v53 = vpop.eup %3578 }
 0xce9   :  { %v2045_v12 = vsel %vm155_vm2, %v4110_v53, 0.0 }
 0xcff   :  { %2049 = vadd.xlane.f32.xlu0 %v2048_v52 }
 0xd03   :  { %2046 = vadd.xlane.f32.xlu1 %v2045_v12 }
 0xd47   :  { %v2005_v9 = vpop.xlane.xlu0 %2004 }
 0xd48   :  { %v2023_v13 = vsub.f32 %v1991_v8, %v2005_v9 }
 0xd4a   :  { %v2033_v54 = vmul.f32 1.442695, %v2023_v13 }
 0xd4b   :  { %v2008_v55 = vpop.xlane.xlu0 %2007 }
 0xd4c   :  { %3580 = vpow2.f32 %v2033_v54  ;;  %v2024_v6 = vsub.f32 %v1992_v23, %v2008_v55 }
 0xd4e   :  { %v2035_v56 = vmul.f32 1.442695, %v2024_v6 }
 0xd4f   :  { %v2014_v59 = vpop.xlane.xlu0 %2013  ;;  %v2011_v4 = vpop.xlane.xlu1 %2010 }
 0xd50   :  { %3582 = vpow2.f32 %v2035_v56  ;;  %v2025_v8 = vsub.f32 %v4089_v26, %v2011_v4  ;;  %v2026_v24 = vsub.f32 %v4092_v27, %v2014_v59 }
 0xd52   :  { %v2037_v10 = vmul.f32 1.442695, %v2025_v8  ;;  %v2039_v5 = vmul.f32 1.442695, %v2026_v24  ;;  %v1477_v24 = vld [vmem:[#allocation2 + $0x64] sm:$0xf] }
 0xd54   :  { %3584 = vpow2.f32 %v2037_v10  ;;  %v2532_v10 = vsel %vm670_vm3, %v1477_v24, 0 }
 0xd55   :  { %3586 = vpow2.f32 %v2039_v5 }
 0xd56   :  { %v4114_v60 = vpop.eup %3580 }
 0xd57   :  { %v2020_v62 = vpop.xlane.xlu0 %2019  ;;  %v2051_v63 = vsel %vm155_vm2, %v4114_v60, 0.0  ;;  %v2017_v23 = vpop.xlane.xlu1 %2016 }
 0xd58   :  { %2052 = vadd.xlane.f32.xlu1 %v2051_v63  ;;  %v2027_v61 = vsub.f32 %v1995_v36, %v2017_v23  ;;  %v2028_v14 = vsub.f32 %v1996_v39, %v2020_v62 }
 0xd5a   :  { %v4118_v1 = vpop.eup %3582  ;;  %v2041_v11 = vmul.f32 1.442695, %v2027_v61  ;;  %v2043_v15 = vmul.f32 1.442695, %v2028_v14 }
 0xd5b   :  { %v2142_v2 = vpop.permute.xlu0 %2141  ;;  %v2054_v37 = vsel %vm155_vm2, %v4118_v1, 0.0  ;;  %v2190_v16 = vpop.permute.xlu1 %2189 }
 0xd5c   :  { %v2147_v3 = vsel %vm670_vm3, %v2142_v2, 0  ;;  %2055 = vadd.xlane.f32.xlu0 %v2054_v37  ;;  %3588 = vpow2.f32 %v2041_v11  ;;  %v2195_v31 = vsel %vm670_vm3, %v2190_v16, 0 }
 0xd5d   :  { %3381 = vmatpush3.bf16.msra.mxu0 %v2147_v3  ;;  %3590 = vpow2.f32 %v2043_v15 }
 0xd5e   :  { %3392 = vmatprep.subr.bf16.mxu0 %v3649_v0 }
 0xd5f   :  { %v2238_v18 = vpop.permute.xlu1 %2237 }
 0xd60   :  { %v2243_v40 = vsel %vm670_vm3, %v2238_v18, 0 }
 0xd69   :  { %2333 = vrot.lane.b32.xlu1 %v4012_v17, %s3647_s22  ;;  %v4130_v17 = vpop.eup %3584 }
 0xd6a   :  { %v2057_v20 = vsel %vm155_vm2, %v4130_v17, 0.0 }
 0xd72   :  { %2285 = vrot.lane.b32.xlu0 %v4014_v32, %s3647_s22  ;;  %v4132_v32 = vpop.eup %3586 }
 0xd73   :  { %v4136_v21 = vpop.eup %3588  ;;  %v2060_v28 = vsel %vm155_vm2, %v4132_v32, 0.0 }
 0xd74   :  { %v2063_v27 = vsel %vm155_vm2, %v4136_v21, 0.0  ;;  %v4142_v29 = vpop.eup %3590 }
 0xd75   :  { %v2066_v30 = vsel %vm155_vm2, %v4142_v29, 0.0 }
 0xd8c   :  { %v2050_v19 = vpop.xlane.xlu0 %2049 }
 0xd8d   :  { %3592 = vrcp.f32 %v2050_v19  ;;  %2058 = vadd.xlane.f32.xlu1 %v2057_v20  ;;  %v1478_v19 = vld [vmem:[#allocation2 + $0x68] sm:$0xf] }
 0xd8e   :  { %v2579_v20 = vsel %vm670_vm3, %v1478_v19, 0 }
 0xd90   :  { %v2047_v26 = vpop.xlane.xlu1 %2046 }
 0xd91   :  { %3594 = vrcp.f32 %v2047_v26  ;;  %2064 = vadd.xlane.f32.xlu1 %v2063_v27  ;;  %2061 = vadd.xlane.f32.xlu0 %v2060_v28  ;;  %v1479_v28 = vld [vmem:[#allocation2 + $0x6c] sm:$0xf] }
 0xd95   :  { %2067 = vadd.xlane.f32.xlu0 %v2066_v30 }
 0xd97   :  { %v3593_v33 = vpop.eup %3592 }
 0xd98   :  { %v2078_v34 = vmul.f32 %v3593_v33, %v3577_v51 }
 0xd9a   :  { %v2086_v35 = vpack.c.bf16 %v2078_v34, %v2078_v34 }
 0xd9b   :  { %v3595_v38 = vpop.eup %3594 }
 0xd9c   :  { %v2077_v41 = vmul.f32 %v3595_v38, %v4110_v53  ;;  %3383 = vmatmul.mubr.msk.bf16.vlgmr.msra.gmra.mrb[64].mxu0 %vm155_vm2, %v2086_v35  ;;  %v2626_v35 = vsel %vm670_vm3, %v1479_v28, 0 }
 0xd9d   :  { %3393 = vmatpush3.bf16.msra.mxu0 %v2243_v40  ;;  %3394 = vmatprep.mubr.msk.bf16.mxu0 %vm3650_vm0, %v3649_v0 }
 0xd9e   :  { %v2085_v42 = vpack.c.bf16 %v2077_v41, %v2077_v41  ;;  %3404 = vmatprep.subr.bf16.mxu0 %v3649_v0 }
 0xda0   :  { %3377 = vmatmul.mubr.msk.bf16.vlgmr.msra.gmra.mrb[64].mxu1 %vm155_vm2, %v2085_v42 }
 0xda1   :  { %3387 = vmatpush3.bf16.msra.mxu1 %v2195_v31  ;;  %3388 = vmatprep.mubr.msk.bf16.mxu1 %vm3650_vm0, %v3649_v0 }
 0xda2   :  { %2429 = vrot.lane.b32.xlu1 %v4025_v25, %s3647_s22  ;;  %3398 = vmatprep.subr.bf16.mxu1 %v3649_v0 }
 0xdab   :  { %2381 = vrot.lane.b32.xlu0 %v4022_v22, %s3647_s22 }
 0xde5   :  { %v2053_v43 = vpop.xlane.xlu1 %2052 }
 0xde6   :  { %3596 = vrcp.f32 %v2053_v43 }
 0xde9   :  { %v2056_v36 = vpop.xlane.xlu0 %2055  ;;  %v2334_v25 = vpop.permute.xlu1 %2333 }
 0xdea   :  { %3598 = vrcp.f32 %v2056_v36  ;;  %v2339_v7 = vsel %vm670_vm3, %v2334_v25, 0 }
 0xded   :  { %v2286_v45 = vpop.permute.xlu0 %2285 }
 0xdee   :  { %v2291_v49 = vsel %vm670_vm3, %v2286_v45, 0 }
 0xdf0   :  { %v3597_v39 = vpop.eup %3596 }
 0xdf1   :  { %v2079_v44 = vmul.f32 %v3597_v39, %v4114_v60 }
 0xdf3   :  { %v2087_v46 = vpack.c.bf16 %v2079_v44, %v2079_v44 }
 0xdf4   :  { %v3599_v47 = vpop.eup %3598 }
 0xdf5   :  { %v2080_v48 = vmul.f32 %v3599_v47, %v4118_v1  ;;  %3389 = vmatmul.mubr.msk.bf16.vlgmr.msra.gmra.mrb[68].mxu1 %vm155_vm2, %v2087_v46  ;;  %v1476_v1 = vld [vmem:[#allocation2 + $0x60] sm:$0xf] }
 0xdf6   :  { %3399 = vmatpush3.bf16.msra.mxu1 %v2291_v49  ;;  %3400 = vmatprep.mubr.msk.bf16.mxu1 %vm3650_vm0, %v3649_v0  ;;  %v2485_v4 = vsel %vm670_vm3, %v1476_v1, 0 }
 0xdf7   :  { %v2088_v22 = vpack.c.bf16 %v2080_v48, %v2080_v48  ;;  %3410 = vmatprep.subr.bf16.mxu1 %v3649_v0 }
 0xdf9   :  { %3395 = vmatmul.mubr.msk.bf16.vlgmr.msra.gmra.mrb[68].mxu0 %vm155_vm2, %v2088_v22 }
 0xdfa   :  { %3405 = vmatpush3.bf16.msra.mxu0 %v2339_v7  ;;  %3406 = vmatprep.mubr.msk.bf16.mxu0 %vm3650_vm0, %v3649_v0 }
 0xdfb   :  { %3416 = vmatprep.subr.bf16.mxu0 %v3649_v0 }
 0xe1a   :  { %v2059_v50 = vpop.xlane.xlu1 %2058 }
 0xe1b   :  { %3600 = vrcp.f32 %v2059_v50 }
 0xe1e   :  { %v2065_v51 = vpop.xlane.xlu1 %2064  ;;  %v2062_v52 = vpop.xlane.xlu0 %2061 }
 0xe1f   :  { %3602 = vrcp.f32 %v2065_v51 }
 0xe20   :  { %3604 = vrcp.f32 %v2062_v52 }
 0xe22   :  { %v2068_v53 = vpop.xlane.xlu0 %2067  ;;  %v2430_v62 = vpop.permute.xlu1 %2429 }
 0xe23   :  { %3606 = vrcp.f32 %v2068_v53  ;;  %v2435_v37 = vsel %vm670_vm3, %v2430_v62, 0 }
 0xe25   :  { %v3601_v12 = vpop.eup %3600 }
 0xe26   :  { %v2081_v9 = vmul.f32 %v3601_v12, %v4130_v17  ;;  %v2382_v13 = vpop.permute.xlu0 %2381 }
 0xe27   :  { %v2387_v56 = vsel %vm670_vm3, %v2382_v13, 0 }
 0xe28   :  { %v2089_v54 = vpack.c.bf16 %v2081_v9, %v2081_v9 }
 0xe29   :  { %v3603_v55 = vpop.eup %3602 }
 0xe2a   :  { %v3605_v6 = vpop.eup %3604  ;;  %3401 = vmatmul.mubr.msk.bf16.vlgmr.msra.gmra.mrb[72].mxu1 %vm155_vm2, %v2089_v54  ;;  %v2083_v60 = vmul.f32 %v3603_v55, %v4136_v21  ;;  %v3047_v54 = vld [vmem:[%s4272_s2 + $0x11] ss:$0 sm:$0xff] }
 0xe2b   :  { %v2082_v59 = vmul.f32 %v3605_v6, %v4132_v32  ;;  %3411 = vmatpush3.bf16.msra.mxu1 %v2387_v56  ;;  %3412 = vmatprep.mubr.msk.bf16.mxu1 %vm3650_vm0, %v3649_v0 }
 0xe2c   :  { %3422 = vmatprep.subr.bf16.mxu1 %v3649_v0  ;;  %v2091_v3 = vpack.c.bf16 %v2083_v60, %v2083_v60 }
 0xe2d   :  { %v2090_v63 = vpack.c.bf16 %v2082_v59, %v2082_v59  ;;  %v3607_v2 = vpop.eup %3606 }
 0xe2e   :  { %v2084_v8 = vmul.f32 %v3607_v2, %v4142_v29 }
 0xe2f   :  { %3407 = vmatmul.mubr.msk.bf16.vlgmr.msra.gmra.mrb[72].mxu0 %vm155_vm2, %v2090_v63 }
 0xe30   :  { %3417 = vmatpush3.bf16.msra.mxu0 %v2435_v37  ;;  %3418 = vmatprep.mubr.msk.bf16.mxu0 %vm3650_vm0, %v3649_v0  ;;  %v2092_v23 = vpack.c.bf16 %v2084_v8, %v2084_v8 }
 0xe31   :  { %3428 = vmatprep.subr.bf16.mxu0 %v3649_v0 }
 0xe32   :  { %3413 = vmatmul.mubr.msk.bf16.vlgmr.msra.gmra.mrb[76].mxu1 %vm155_vm2, %v2091_v3 }
 0xe33   :  { %3423 = vmatpush3.bf16.msra.mxu1 %v2485_v4  ;;  %3424 = vmatprep.mubr.msk.bf16.mxu1 %vm3650_vm0, %v3649_v0 }
 0xe34   :  { %3434 = vmatprep.subr.bf16.mxu1 %v3649_v0 }
 0xe37   :  { %3419 = vmatmul.mubr.msk.bf16.vlgmr.msra.gmra.mrb[76].mxu0 %vm155_vm2, %v2092_v23 }
 0xe38   :  { %3430 = vmatprep.mubr.msk.bf16.mxu0 %vm3650_vm0, %v3649_v0  ;;  %3429 = vmatpush3.bf16.msra.mxu0 %v2532_v10 }
 0xe39   :  { %3440 = vmatprep.subr.bf16.mxu0 %v3649_v0 }
 0xe6f   :  { %v2183_v61 = vpop.f32.mrb[64].mxu0 }
 0xe70   :  { %v3384_v5 = vpop.f32.mrb[65].mxu0 }
 0xe71   :  { %v2186_v11 = vpop.f32.mrb[66].mxu0 }
 0xe72   :  { %v3385_v14 = vpop.f32.mrb[67].mxu0 }
 0xe73   :  { %v2135_v15 = vpop.f32.mrb[64].mxu1 }
 0xe74   :  { %v2477_v16 = vpack.c.bf16 %v2183_v61, %v2135_v15  ;;  %v3378_v17 = vpop.f32.mrb[65].mxu1 }
 0xe75   :  { %v2138_v32 = vpop.f32.mrb[66].mxu1 }
 0xe76   :  { %v3379_v18 = vpop.f32.mrb[67].mxu1  ;;  %3425 = vmatmul.mubr.msk.bf16.vlgmr.msra.gmra.mrb[80].mxu1 %vm155_vm2, %v2477_v16 }
 0xe77   :  { %3436 = vmatprep.mubr.msk.bf16.mxu1 %vm3650_vm0, %v3649_v0  ;;  %3435 = vmatpush3.bf16.msra.mxu1 %v2579_v20 }
 0xe78   :  { %3446 = vmatprep.subr.bf16.mxu1 %v3649_v0 }
 0xec8   :  { %v2231_v21 = vpop.f32.mrb[68].mxu1 }
 0xec9   :  { %v3390_v26 = vpop.f32.mrb[69].mxu1 }
 0xeca   :  { %v2234_v27 = vpop.f32.mrb[70].mxu1 }
 0xecb   :  { %v3391_v29 = vpop.f32.mrb[71].mxu1 }
 0xecc   :  { %v2279_v30 = vpop.f32.mrb[68].mxu0 }
 0xecd   :  { %v2478_v33 = vpack.c.bf16 %v2279_v30, %v2231_v21  ;;  %v3396_v34 = vpop.f32.mrb[69].mxu0 }
 0xece   :  { %v2282_v38 = vpop.f32.mrb[70].mxu0  ;;  %v3530_v34 = vld [vmem:[#allocation2 + $0x80] sm:$0xff]  }
 0xecf   :  { %v3397_v40 = vpop.f32.mrb[71].mxu0  ;;  %3431 = vmatmul.mubr.msk.bf16.vlgmr.msra.gmra.mrb[80].mxu0 %vm155_vm2, %v2478_v33  ;;  %v3528_v33 = vld [vmem:[#allocation2 + $0x70] sm:$0xff]  }
 0xed0   :  { %3441 = vmatpush3.bf16.msra.mxu0 %v2626_v35  ;;  %3442 = vmatprep.mubr.msk.bf16.mxu0 %vm3650_vm0, %v3649_v0  ;;  %v3531_v35 = vld [vmem:[#allocation2 + $0x88] sm:$0xff]  }
 0xed1   :  { %3454 = vmatprep.subr.bf16.mxu0 %v3649_v0 }
 0xefd   :  { %v2327_v41 = vpop.f32.mrb[72].mxu1 }
 0xefe   :  { %v3402_v42 = vpop.f32.mrb[73].mxu1 }
 0xeff   :  { %v2330_v31 = vpop.f32.mrb[74].mxu1 }
 0xf00   :  { %v3403_v43 = vpop.f32.mrb[75].mxu1 }
 0xf02   :  { %v2375_v36 = vpop.f32.mrb[72].mxu0 }
 0xf03   :  { %v2479_v39 = vpack.c.bf16 %v2375_v36, %v2327_v41  ;;  %v3408_v44 = vpop.f32.mrb[73].mxu0 }
 0xf04   :  { %v2378_v45 = vpop.f32.mrb[74].mxu0  ;;  %v3048_v44 = vld [vmem:[%s4272_s2 + $0x14] ss:$0 sm:$0xff] }
 0xf05   :  { %v3409_v46 = vpop.f32.mrb[75].mxu0  ;;  %3437 = vmatmul.mubr.msk.bf16.vlgmr.msra.gmra.mrb[84].mxu1 %vm155_vm2, %v2479_v39  ;;  %v2423_v47 = vpop.f32.mrb[76].mxu1 }
 0xf06   :  { %v3414_v48 = vpop.f32.mrb[77].mxu1  ;;  %3450 = vmatprep.mubr.msk.bf16.mxu1 %vm3650_vm0, %v3649_v0  ;;  %3447 = vmatpush3.bf16.msra.mxu1 %v3528_v33 }
 0xf07   :  { %v2426_v49 = vpop.f32.mrb[78].mxu1  ;;  %3448 = vmatprep.subr.bf16.mxu1 %v3649_v0  ;;  %v3049_v48 = vld [vmem:[%s4272_s2 + $0x15] ss:$0 sm:$0xff] }
 0xf08   :  { %v3415_v25 = vpop.f32.mrb[79].mxu1 }
 0xf0a   :  { %v2471_v22 = vpop.f32.mrb[76].mxu0 }
 0xf0b   :  { %v2480_v7 = vpack.c.bf16 %v2471_v22, %v2423_v47  ;;  %v3420_v50 = vpop.f32.mrb[77].mxu0 }
 0xf0c   :  { %v2474_v51 = vpop.f32.mrb[78].mxu0  ;;  %v3532_v50 = vld [vmem:[#allocation2 + $0x90] sm:$0xff]  }
 0xf0d   :  { %v3421_v52 = vpop.f32.mrb[79].mxu0  ;;  %3443 = vmatmul.mubr.msk.bf16.vlgmr.msra.gmra.mrb[84].mxu0 %vm155_vm2, %v2480_v7  ;;  %v3533_v51 = vld [vmem:[#allocation2 + $0x98] sm:$0xff]  }
 0xf0e   :  { %3462 = vmatprep.mubr.msk.bf16.mxu0 %vm3650_vm0, %v3649_v0  ;;  %3455 = vmatpush3.bf16.msra.mxu0 %v3530_v34  ;;  %v3050_v52 = vld [vmem:[%s4272_s2 + $0x12] ss:$0 sm:$0xff] }
 0xf0f   :  { %3456 = vmatprep.subr.bf16.mxu0 %v3649_v0 }
 0xf12   :  { %3457 = vmatpush3.bf16.msra.mxu0 %v3531_v35  ;;  %v3060_v35 = vld [vmem:[%s4272_s2 + $0x16] ss:$0 sm:$0xff] }
 0xf13   :  { %3458 = vmatprep.subr.bf16.mxu0 %v3649_v0 }
 0xf16   :  { %3459 = vmatpush3.bf16.msra.mxu0 %v3532_v50 }
 0xf17   :  { %3460 = vmatprep.subr.bf16.mxu0 %v3649_v0 }
 0xf1a   :  { %3461 = vmatpush3.bf16.msra.mxu0 %v3533_v51 }
 0xf49   :  { %v2521_v53 = vpop.f32.mrb[80].mxu1 }
 0xf4a   :  { %v3426_v12 = vpop.f32.mrb[81].mxu1  ;;  %v2673_v55 = vadd.f32 %v3047_v54, %v2521_v53 }
 0xf4b   :  { %v2524_v9 = vpop.f32.mrb[82].mxu1 }
 0xf4c   :  { %v3427_v13 = vpop.f32.mrb[83].mxu1  ;;  %v2674_v56 = vadd.f32 %v3047_v54, %v2524_v9 }
 0xfa2   :  { %v2568_v6 = vpop.f32.mrb[80].mxu0 }
 0xfa3   :  { %v2675_v59 = vadd.f32 %v2673_v55, %v2568_v6  ;;  %v3432_v60 = vpop.f32.mrb[81].mxu0 }
 0xfa4   :  { %v2571_v62 = vpop.f32.mrb[82].mxu0  ;;  %v3054_v60 = vld [vmem:[%s4272_s2 + $0x13] ss:$0 sm:$0xff] }
 0xfa5   :  { %v2676_v63 = vadd.f32 %v2674_v56, %v2571_v62  ;;  %v3433_v1 = vpop.f32.mrb[83].mxu0 }
 0xfd8   :  { %v2615_v2 = vpop.f32.mrb[84].mxu1 }
 0xfd9   :  { %v2677_v37 = vadd.f32 %v2675_v59, %v2615_v2  ;;  %v3438_v3 = vpop.f32.mrb[85].mxu1 }
 0xfda   :  { %v2618_v4 = vpop.f32.mrb[86].mxu1 }
 0xfdb   :  { %v2678_v8 = vadd.f32 %v2676_v63, %v2618_v4  ;;  %v3439_v23 = vpop.f32.mrb[87].mxu1 }
 0xfe0   :  { %v2662_v24 = vpop.f32.mrb[84].mxu0 }
 0xfe1   :  { %v2679_v10 = vadd.f32 %v2677_v37, %v2662_v24  ;;  %v3444_v61 = vpop.f32.mrb[85].mxu0 }
 0xfe2   :  { %v2665_v5 = vpop.f32.mrb[86].mxu0 }
 0xfe3   :  { %v2680_v11 = vadd.f32 %v2678_v8, %v2665_v5  ;;  %v3445_v14 = vpop.f32.mrb[87].mxu0  ;;  %v2681_v15 = vadd.f32 %v2679_v10, %v3983_v57 }
 0xfe5   :  { %v2683_v16 = vsel %vm79_vm1, %v2681_v15, 0.0  ;;  %v2682_v17 = vadd.f32 %v2680_v11, %v3985_v58  ;;  %v3529_v58 = vld [vmem:[#allocation2 + $0x78] sm:$0xff]  }
 0xfe6   :  { %2684 = vadd.xlane.f32.xlu0 %v2683_v16  ;;  %3449 = vmatpush3.bf16.msra.mxu1 %v3529_v58 }
 0xfe7   :  { %v2686_v32 = vsel %vm79_vm1, %v2682_v17, 0.0  ;;  %3466 = vmatprep.subr.bf16.mxu1 %v3649_v0 }
 0xfe8   :  { %2687 = vadd.xlane.f32.xlu1 %v2686_v32 }
0x1073   :  { %v2685_v18 = vpop.xlane.xlu0 %2684 }
0x1074   :  { %v2689_v19 = vmul.f32 0.03125, %v2685_v18 }
0x1075   :  { %v2688_v20 = vpop.xlane.xlu1 %2687 }
0x1076   :  { %v2691_v21 = vsub.f32 %v2681_v15, %v2689_v19  ;;  %v2690_v26 = vmul.f32 0.03125, %v2688_v20  ;;  %v3534_v19 = vld [vmem:[#allocation2 + $0xa0] sm:$0xff]   ;;  %v3535_v20 = vld [vmem:[#allocation2 + $0xa8] sm:$0xff]  }
0x1078   :  { %v2692_v27 = vsub.f32 %v2682_v17, %v2690_v26  ;;  %v2693_v28 = vmul.f32 %v2691_v21, %v2691_v21  ;;  %v3655_v26 = vmov 40  }
0x1079   :  { %3516 = vset.pattern.permute.xlu1 %v3655_v26  ;;  %3517 = vset.pattern.permute.xlu0 %v3655_v26 }
0x107a   :  { %v2695_v29 = vsel %vm79_vm1, %v2693_v28, 0.0  ;;  %v2694_v30 = vmul.f32 %v2692_v27, %v2692_v27  ;;  %v3621_v28 = vld [vmem:[%s4270_s0 + $0x8] sm:$0xff] }
0x107b   :  { %2696 = vadd.xlane.f32.xlu0 %v2695_v29 }
0x107c   :  { %v2698_v57 = vsel %vm79_vm1, %v2694_v30, 0.0 }
0x107f   :  { %2699 = vadd.xlane.f32.xlu0 %v2698_v57 }
0x1108   :  { %v2697_v38 = vpop.xlane.xlu0 %2696 }
0x1109   :  { %v2701_v40 = vmul.f32 0.03125, %v2697_v38 }
0x110b   :  { %v2703_v41 = vadd.f32 1e-06, %v2701_v40 }
0x110c   :  { %v2700_v42 = vpop.xlane.xlu0 %2699 }
0x110d   :  { %3608 = vrsqrt.f32 %v2703_v41  ;;  %v2702_v31 = vmul.f32 0.03125, %v2700_v42 }
0x110f   :  { %v2704_v43 = vadd.f32 1e-06, %v2702_v31  ;;  %v3061_v31 = vld [vmem:[%s4272_s2 + $0x17] ss:$0 sm:$0xff] }
0x1111   :  { %3610 = vrsqrt.f32 %v2704_v43 }
0x1117   :  { %v3609_v36 = vpop.eup %3608 }
0x1118   :  { %v2707_v39 = vmul.f32 %v3609_v36, %v2691_v21  ;;  %v2901_v21 = vld [vmem:[%s4272_s2 + $0x18] sm:$0x1] }
0x1119   :  { %3474 = vpush %v2901_v21 }
0x111a   :  { %v2713_v46 = vmul.f32 %v3048_v44, %v2707_v39 }
0x111b   :  { %v3611_v45 = vpop.eup %3610 }
0x111c   :  { %v2708_v47 = vmul.f32 %v3611_v45, %v2692_v27  ;;  %v2719_v25 = vadd.f32 %v3049_v48, %v2713_v46  ;;  %v3620_v27 = vld [vmem:[%s4270_s0] sm:$0xff] }
0x111e   :  { %v2714_v49 = vmul.f32 %v3048_v44, %v2708_v47 }
0x1120   :  { %v2720_v22 = vadd.f32 %v3049_v48, %v2714_v49 }
0x1122   :  { %v2721_v7 = vpack.c.bf16 %v2720_v22, %v2719_v25 }
0x1124   :  { %3451 = vmatmul.mubr.msk.bf16.vlgmr.msra.gmra.mrb[88].mxu1 %vm79_vm1, %v2721_v7 }
0x1125   :  { %3470 = vmatprep.mubr.msk.bf16.mxu1 %vm3650_vm0, %v3649_v0  ;;  %3467 = vmatpush3.bf16.msra.mxu1 %v3534_v19 }
0x1126   :  { %3468 = vmatprep.subr.bf16.mxu1 %v3649_v0 }
0x1129   :  { %3469 = vmatpush3.bf16.msra.mxu1 %v3535_v20 }
0x114a   :  { %s3475_s17 = spop %3474 }
0x114b   :  { %v2905_v45 = vstv %s3475_s17 }
0x11f7   :  { %v2775_v53 = vpop.f32.mrb[88].mxu1 }
0x11f8   :  { %v2776_v12 = vadd.f32 %v3050_v52, %v2775_v53  ;;  %v3452_v9 = vpop.f32.mrb[89].mxu1 }
0x11f9   :  { %v2778_v13 = vpop.f32.mrb[90].mxu1 }
0x11fa   :  { %v2779_v54 = vadd.f32 %v3050_v52, %v2778_v13  ;;  %v3453_v55 = vpop.f32.mrb[91].mxu1  ;;  %v2782_v6 = vmax.f32 %v2776_v12, 0.0 }
0x11fc   :  { %v2783_v56 = vmax.f32 %v2779_v54, 0.0 }
0x11fe   :  { %v2784_v59 = vpack.c.bf16 %v2783_v56, %v2782_v6 }
0x1200   :  { %3463 = vmatmul.mubr.msk.bf16.vlgmr.msra.gmra.mrb[88].mxu0 %vm1387_vm4, %v2784_v59 }
0x12d3   :  { %v2850_v62 = vpop.f32.mrb[88].mxu0 }
0x12d4   :  { %v2851_v63 = vadd.f32 %v3054_v60, %v2850_v62  ;;  %v3464_v1 = vpop.f32.mrb[89].mxu0 }
0x12d5   :  { %v2853_v2 = vpop.f32.mrb[90].mxu0 }
0x12d6   :  { %v2854_v37 = vadd.f32 %v3054_v60, %v2853_v2  ;;  %v3465_v3 = vpop.f32.mrb[91].mxu0  ;;  %v2857_v4 = vadd.f32 %v2851_v63, %v2719_v25 }
0x12d8   :  { %v2859_v8 = vsel %vm79_vm1, %v2857_v4, 0.0  ;;  %v2858_v23 = vadd.f32 %v2854_v37, %v2720_v22 }
0x12d9   :  { %2860 = vadd.xlane.f32.xlu1 %v2859_v8 }
0x12da   :  { %v2862_v24 = vsel %vm79_vm1, %v2858_v23, 0.0 }
0x12db   :  { %2863 = vadd.xlane.f32.xlu0 %v2862_v24 }
0x1366   :  { %v2861_v10 = vpop.xlane.xlu1 %2860 }
0x1367   :  { %v2865_v61 = vmul.f32 0.03125, %v2861_v10 }
0x1368   :  { %v2864_v5 = vpop.xlane.xlu0 %2863 }
0x1369   :  { %v2867_v11 = vsub.f32 %v2857_v4, %v2865_v61  ;;  %v2866_v14 = vmul.f32 0.03125, %v2864_v5 }
0x136b   :  { %v2868_v15 = vsub.f32 %v2858_v23, %v2866_v14  ;;  %v2869_v16 = vmul.f32 %v2867_v11, %v2867_v11 }
0x136d   :  { %v2871_v17 = vsel %vm79_vm1, %v2869_v16, 0.0  ;;  %v2870_v32 = vmul.f32 %v2868_v15, %v2868_v15 }
0x136e   :  { %2872 = vadd.xlane.f32.xlu1 %v2871_v17 }
0x136f   :  { %v2874_v18 = vsel %vm79_vm1, %v2870_v32, 0.0 }
0x1370   :  { %2875 = vadd.xlane.f32.xlu0 %v2874_v18 }
0x137f   :  { %2964 = vperm.xlu1 %3516, %v3620_v27  }
0x1386   :  { %2968 = vperm.xlu0 %3517, %v3621_v28  }
0x13fb   :  { %v2873_v0 = vpop.xlane.xlu1 %2872 }
0x13fc   :  { %v2877_v29 = vmul.f32 0.03125, %v2873_v0 }
0x13fd   :  { %v2876_v30 = vpop.xlane.xlu0 %2875 }
0x13fe   :  { %v2879_v57 = vadd.f32 1e-06, %v2877_v29  ;;  %v2878_v33 = vmul.f32 0.03125, %v2876_v30 }
0x13ff   :  { %v2965_v47 = vpop.permute.xlu1 %2964 }
0x1400   :  { %3612 = vrsqrt.f32 %v2879_v57  ;;  %v2880_v58 = vadd.f32 1e-06, %v2878_v33 }
0x1402   :  { %3614 = vrsqrt.f32 %v2880_v58 }
0x1405   :  { %v2969_v22 = vpop.permute.xlu0 %2968 }
0x140a   :  { %v3613_v34 = vpop.eup %3612 }
0x140b   :  { %v2883_v38 = vmul.f32 %v3613_v34, %v2867_v11 }
0x140c   :  { %v3615_v40 = vpop.eup %3614 }
0x140d   :  { %v2889_v41 = vmul.f32 %v3060_v35, %v2883_v38  ;;  %v2884_v42 = vmul.f32 %v3615_v40, %v2868_v15 }
0x140f   :  { %v2890_v43 = vmul.f32 %v3060_v35, %v2884_v42  ;;  %v2895_v36 = vadd.f32 %v3061_v31, %v2889_v41 }
0x1411   :  { %v2896_v39 = vadd.f32 %v3061_v31, %v2890_v43 }
0x1413   :  { %v2902_v44 = vpack.c.bf16 %v2896_v39, %v2895_v36 }
0x1415   :  { %3471 = vmatmul.mubr.msk.bf16.vlgmr.msra.gmra.mrb[92].mxu1 %vm79_vm1, %v2902_v44 }
0x14e8   :  { %v2956_v46 = vpop.f32.mrb[92].mxu1 }
0x14e9   :  { %v2957_v48 = vadd.f32 %v2956_v46, %v2905_v45  ;;  %v3472_v49 = vpop.f32.mrb[93].mxu1 }
0x14ea   :  { %v2959_v25 = vpop.f32.mrb[94].mxu1 }
0x14eb   :  { %v2971_v7 = vadd.f32 %v2965_v47, %v2957_v48  ;;  %v2960_v50 = vadd.f32 %v2959_v25, %v2905_v45  ;;  %v3473_v51 = vpop.f32.mrb[95].mxu1 }
0x14ed   :  { %v2973_v52 = vmul.f32 1.442695, %v2971_v7  ;;  %v2972_v53 = vadd.f32 %v2969_v22, %v2960_v50 }
0x14ef   :  { %3616 = vpow2.f32 %v2973_v52  ;;  %v2975_v12 = vmul.f32 1.442695, %v2972_v53 }
0x14f1   :  { %3618 = vpow2.f32 %v2975_v12 }
0x14f9   :  { %v3617_v9 = vpop.eup %3616 }
0x14fa   :  { %2977 = vst [vmem:[%s4273_s3] sm:$0xff] %v3617_v9 }
0x14fb   :  { %v3619_v13 = vpop.eup %3618 }
0x14fc   :  { %2978 = vst [vmem:[%s4273_s3 + $0x8] sm:$0xff] %v3619_v13 }
0x14fd   :  { %2983 = vsyncpa [#allocation3], 1 }

</bundles_post_ra>
